<compile_context>
chip_gen: v7x
topology: tpu7x:2x2x1
jax: 0.10.0
libtpu: 0.0.40
codegen_flags: <defaults>
</compile_context>

<pallas_src>
import jax
import jax.numpy as jnp
import numpy as np
from jax import lax
from jax.experimental import pallas as pl
from jax.experimental.pallas import tpu as pltpu

# ---------------------------------------------------------------------------
# Small configuration (module defaults are features=768, hidden=1024; we use
# reduced but structurally identical sizes; the down-stack dims 128/64/32/1
# are fixed by the module definition).
# ---------------------------------------------------------------------------
FEATURES = 64
HIDDEN = 128
OUTPUTS = 1
BATCH = 16

_INV_SQRT2 = np.float32(1.0 / np.sqrt(2.0))   # PyTorch computes erf(x * M_SQRT1_2)
_SQRT2 = np.float32(np.sqrt(2.0))
_LN_EPS = np.float32(1e-5)


def _gelu(x):
    # exact GELU (PyTorch nn.GELU default, approximate='none'); multiply, not divide.
    return 0.5 * x * (1.0 + lax.erf(x * _INV_SQRT2))


def _ln_stats(x):
    # Single-pass LayerNorm statistics: two *independent* reductions, then
    # var = E[x^2] - mu^2 (no serialized second pass over (x - mu)^2).
    inv_n = np.float32(1.0 / x.shape[-1])
    s = jnp.sum(x, axis=-1, keepdims=True)
    s2 = jnp.sum(x * x, axis=-1, keepdims=True)
    mu = s * inv_n
    var = s2 * inv_n - mu * mu
    return mu, lax.rsqrt(var + _LN_EPS)


def _layernorm(x, g, b):
    mu, rstd = _ln_stats(x)
    return (x - mu) * rstd * g + b


def _layernorm_noaffine(x):
    mu, rstd = _ln_stats(x)
    return (x - mu) * rstd


def _linear(x, w, b):
    return jnp.dot(x, w, preferred_element_type=jnp.float32) + b


# ---------------------------------------------------------------------------
# Kernel.
#   x_ref       : (TB, F)
#   w_big_ref   : (4, H, H)    = {w_r1 (LN-folded), w_r2, w_r3, w_d1}
#   w_small_ref : (4, 128, 128) zero-padded {w_up, w_d2, w_d3, w_d4}
#   vec_ref     : (16, 128)    packed biases / LN gammas / LN betas
# ---------------------------------------------------------------------------
def predictor_kernel(x_ref, w_big_ref, w_small_ref, vec_ref, o_ref):
    x = x_ref[...].astype(jnp.float32)          # (TB, F)
    v = vec_ref[...]                            # (16, 128) packed vector slab

    b_up, g_ln1, be_ln1 = v[0:1, :], v[1:2, :], v[2:3, :]
    b_r1, b_r2, b_r3 = v[3:4, :], v[4:5, :], v[5:6, :]
    b_d1, g_d1, be_d1 = v[6:7, :], v[7:8, :], v[8:9, :]
    b_d2, g_d2, be_d2 = v[9:10, :64], v[10:11, :64], v[11:12, :64]
    b_d3, g_d3, be_d3 = v[12:13, :32], v[13:14, :32], v[14:15, :32]
    b_d4 = v[15:16, :OUTPUTS]

    # Static sub-slices of the zero-padded 128x128 weight slab.
    w_up = w_small_ref[0][:FEATURES, :]          # (F, H)   = (64, 128)
    w_d2 = w_small_ref[1][:, :64]                # (128, 64)
    w_d3 = w_small_ref[2][:64, :32]              # (64, 32)
    w_d4 = w_small_ref[3][:32, :OUTPUTS]         # (32, 1)

    # ---- up: Linear(F->H) -> LayerNorm -> GELU ----
    y = _gelu(_layernorm(_linear(x, w_up, b_up), g_ln1, be_ln1))          # (TB, H)

    # ---- ResBlock: y + long(norm(y)); pre-LN affine folded into w_r1/b_r1 ----
    r = _layernorm_noaffine(y)
    r = _gelu(_linear(r, w_big_ref[0], b_r1))
    r = _gelu(_linear(r, w_big_ref[1], b_r2))
    r = _linear(r, w_big_ref[2], b_r3)
    y = y + r

    # ---- down ----
    z = _gelu(_layernorm(_linear(y, w_big_ref[3], b_d1), g_d1, be_d1))    # (TB, 128)
    z = _linear(z, w_d2, b_d2)                                            # (TB, 64)
    z = _layernorm(z, g_d2, be_d2)
    # Dropout(0.1): eval mode -> identity (no-op)
    z = _gelu(z)
    z = _gelu(_layernorm(_linear(z, w_d3, b_d3), g_d3, be_d3))            # (TB, 32)
    z = _linear(z, w_d4, b_d4)                                            # (TB, 1)

    # ---- head: outputs == 1 -> (tanh(z) + 1) / 2 ----
    o_ref[...] = ((jnp.tanh(z) + 1.0) * 0.5).astype(o_ref.dtype)


# ---------------------------------------------------------------------------
# Parameter construction (PyTorch-layout semantics, weights stored [in, out]).
# LayerNorm affines are randomized slightly so the LN fold is actually tested.
# ---------------------------------------------------------------------------
def init_params(key, features=FEATURES, hidden=HIDDEN, outputs=OUTPUTS):
    ks = iter(jax.random.split(key, 64))

    def lin(fan_in, fan_out):
        w = jax.random.normal(next(ks), (fan_in, fan_out), jnp.float32)
        w = w * np.float32(1.0 / np.sqrt(fan_in))
        b = 0.01 * jax.random.normal(next(ks), (1, fan_out), jnp.float32)
        return w, b

    def ln(dim):
        g = 1.0 + 0.05 * jax.random.normal(next(ks), (1, dim), jnp.float32)
        b = 0.01 * jax.random.normal(next(ks), (1, dim), jnp.float32)
        return g, b

    params = []
    params += lin(features, hidden)     # w_up, b_up
    params += ln(hidden)                # g_ln1, be_ln1
    params += ln(hidden)                # g_lnr, be_lnr   (ResBlock pre-LN)
    params += lin(hidden, hidden)       # w_r1, b_r1
    params += lin(hidden, hidden)       # w_r2, b_r2
    params += lin(hidden, hidden)       # w_r3, b_r3
    params += lin(hidden, 128)          # w_d1, b_d1
    params += ln(128)                   # g_d1, be_d1
    params += lin(128, 64)              # w_d2, b_d2
    params += ln(64)                    # g_d2, be_d2
    params += lin(64, 32)               # w_d3, b_d3
    params += ln(32)                    # g_d3, be_d3
    params += lin(32, outputs)          # w_d4, b_d4
    return params


def pack_params(params):
    """Fold ResBlock pre-LN affine into w_r1/b_r1 and pack params into 3 arrays.

    NOTE: this packing is valid for the test config (hidden == 128).  At the
    module defaults (hidden=1024) w_up (768,1024) and w_d1 (1024,128) no longer
    fit the (H,H) / (128,128) slabs and must stay as separate (ideally bf16)
    inputs; keep the packing shape-aware when scaling up.
    """
    (w_up, b_up, g_ln1, be_ln1,
     g_lnr, be_lnr, w_r1, b_r1, w_r2, b_r2, w_r3, b_r3,
     w_d1, b_d1, g_d1, be_d1,
     w_d2, b_d2, g_d2, be_d2,
     w_d3, b_d3, g_d3, be_d3,
     w_d4, b_d4) = params

    # LN(y) @ W + b == norm(y) @ (diag(g) @ W) + (be @ W + b)
    w_r1f = g_lnr.reshape(-1, 1) * w_r1
    b_r1f = b_r1 + be_lnr @ w_r1

    w_big = jnp.stack([w_r1f, w_r2, w_r3, w_d1], axis=0)            # (4, H, H)

    def pad_plane(w):
        return jnp.pad(w, ((0, 128 - w.shape[0]), (0, 128 - w.shape[1])))

    w_small = jnp.stack([pad_plane(w_up), pad_plane(w_d2),
                         pad_plane(w_d3), pad_plane(w_d4)], axis=0)  # (4, 128, 128)

    def pad128(row):
        row = row.reshape(1, -1)
        return jnp.pad(row, ((0, 0), (0, 128 - row.shape[1])))

    vec_rows = [b_up, g_ln1, be_ln1,
                b_r1f, b_r2, b_r3,
                b_d1, g_d1, be_d1,
                b_d2, g_d2, be_d2,
                b_d3, g_d3, be_d3,
                b_d4]
    vecs = jnp.concatenate([pad128(r) for r in vec_rows], axis=0)    # (16, 128)

    return (w_big, w_small, vecs)


# ---------------------------------------------------------------------------
# Wrapper.  tb defaults to the full batch for small batches (single grid step,
# no pointless pipelining); for large batches it caps at 256 (MXU-matched on
# v6e/v7x — pass tb=128 on v5e) so grid > 1, the BlockSpec pipeline overlaps
# x-tile DMA / writeback with compute, and v7x megacore can shard the batch.
# Weight specs use constant index maps so they stay resident across steps.
# ---------------------------------------------------------------------------
def predictor_forward(x, packed, *, tb=None):
    w_big, w_small, vecs = packed
    b, f = x.shape
    if tb is None:
        tb = b if b <= 256 else 256
    assert b % tb == 0, "ragged batches not handled; pad the batch to a multiple of tb"

    def resident(p):
        nd = p.ndim
        return pl.BlockSpec(p.shape, lambda i, _nd=nd: (0,) * _nd)

    return pl.pallas_call(
        predictor_kernel,
        out_shape=jax.ShapeDtypeStruct((b, OUTPUTS), jnp.float32),
        grid_spec=pltpu.PrefetchScalarGridSpec(
            num_scalar_prefetch=0,
            grid=(b // tb,),
            in_specs=[pl.BlockSpec((tb, f), lambda i: (i, 0)),
                      resident(w_big), resident(w_small), resident(vecs)],
            # (tb, 1) output is a masked 1-lane store; negligible at this size.
            out_specs=pl.BlockSpec((tb, OUTPUTS), lambda i: (i, 0)),
        ),
        compiler_params=pltpu.CompilerParams(
            dimension_semantics=("parallel",),
            vmem_limit_bytes=32 * 1024 * 1024,
        ),
    )(x, w_big, w_small, vecs)


# ---------------------------------------------------------------------------
# Pure-JAX reference (mirrors the PyTorch forward in eval mode, unfolded,
# two-pass LayerNorm, divide-form GELU).
# ---------------------------------------------------------------------------
def reference_forward(x, params):
    (w_up, b_up, g_ln1, be_ln1,
     g_lnr, be_lnr, w_r1, b_r1, w_r2, b_r2, w_r3, b_r3,
     w_d1, b_d1, g_d1, be_d1,
     w_d2, b_d2, g_d2, be_d2,
     w_d3, b_d3, g_d3, be_d3,
     w_d4, b_d4) = params

    def gelu(v):
        return 0.5 * v * (1.0 + lax.erf(v / _SQRT2))

    def layernorm(v, g, b):
        mu = jnp.mean(v, axis=-1, keepdims=True)
        var = jnp.mean((v - mu) ** 2, axis=-1, keepdims=True)
        return (v - mu) / jnp.sqrt(var + _LN_EPS) * g + b

    y = gelu(layernorm(x @ w_up + b_up, g_ln1, be_ln1))
    r = layernorm(y, g_lnr, be_lnr)
    r = gelu(r @ w_r1 + b_r1)
    r = gelu(r @ w_r2 + b_r2)
    r = r @ w_r3 + b_r3
    y = y + r
    z = gelu(layernorm(y @ w_d1 + b_d1, g_d1, be_d1))
    z = gelu(layernorm(z @ w_d2 + b_d2, g_d2, be_d2))  # dropout identity in eval
    z = gelu(layernorm(z @ w_d3 + b_d3, g_d3, be_d3))
    z = z @ w_d4 + b_d4
    return (jnp.tanh(z) + 1.0) / 2.0


if __name__ == "__main__":
    key = jax.random.PRNGKey(0)
    k_x, k_p = jax.random.split(key)

    x = jax.random.normal(k_x, (BATCH, FEATURES), jnp.float32)
    params = init_params(k_p)
    packed = pack_params(params)

    fwd = jax.jit(lambda xv, *pv: predictor_forward(xv, pv))
    out = jax.block_until_ready(fwd(x, *packed))

    ref = reference_forward(x, params)
    np.testing.assert_allclose(np.asarray(out), np.asarray(ref), rtol=1e-4, atol=1e-4)

    assert out.shape == (BATCH, OUTPUTS)
    assert bool(jnp.all((out >= 0.0) & (out <= 1.0)))
    print("KERNEL_OK")
</pallas_src>

<mosaic_0001>
module attributes {stable_mosaic.version = 11 : i64} {
  func.func @predictor_kernel(%arg0: i32, %arg1: memref<16x64xf32, #tpu.memory_space<vmem>>, %arg2: memref<4x128x128xf32, #tpu.memory_space<vmem>>, %arg3: memref<4x128x128xf32, #tpu.memory_space<vmem>>, %arg4: memref<16x128xf32, #tpu.memory_space<vmem>>, %arg5: memref<16x1xf32, #tpu.memory_space<vmem>>) attributes {dimension_semantics = [#tpu.dimension_semantics<parallel>], iteration_bounds = array<i64: 1>, scalar_prefetch = 0 : i64, scratch_operands = 0 : i64, tpu.core_type = #tpu.core_type<tc>, window_params = [{transform_indices = @transform_0, window_bounds = array<i64: 16, 64>}, {pipeline_mode = #tpu.pipeline_mode<synchronous>, transform_indices = @transform_1, window_bounds = array<i64: 4, 128, 128>}, {pipeline_mode = #tpu.pipeline_mode<synchronous>, transform_indices = @transform_2, window_bounds = array<i64: 4, 128, 128>}, {pipeline_mode = #tpu.pipeline_mode<synchronous>, transform_indices = @transform_3, window_bounds = array<i64: 16, 128>}, {transform_indices = @transform_4, window_bounds = array<i64: 16, 1>}]} {
    %c0 = arith.constant 0 : index
    %c0_0 = arith.constant 0 : index
    %0 = vector.load %arg1[%c0, %c0_0] : memref<16x64xf32, #tpu.memory_space<vmem>>, vector<16x64xf32>
    %c0_1 = arith.constant 0 : index
    %c0_2 = arith.constant 0 : index
    %1 = vector.load %arg4[%c0_1, %c0_2] : memref<16x128xf32, #tpu.memory_space<vmem>>, vector<16x128xf32>
    %2 = vector.extract_strided_slice %1 {offsets = [0, 0], sizes = [1, 128], strides = [1, 1]} : vector<16x128xf32> to vector<1x128xf32>
    %3 = vector.extract_strided_slice %1 {offsets = [1, 0], sizes = [1, 128], strides = [1, 1]} : vector<16x128xf32> to vector<1x128xf32>
    %4 = vector.extract_strided_slice %1 {offsets = [2, 0], sizes = [1, 128], strides = [1, 1]} : vector<16x128xf32> to vector<1x128xf32>
    %5 = vector.extract_strided_slice %1 {offsets = [3, 0], sizes = [1, 128], strides = [1, 1]} : vector<16x128xf32> to vector<1x128xf32>
    %6 = vector.extract_strided_slice %1 {offsets = [4, 0], sizes = [1, 128], strides = [1, 1]} : vector<16x128xf32> to vector<1x128xf32>
    %7 = vector.extract_strided_slice %1 {offsets = [5, 0], sizes = [1, 128], strides = [1, 1]} : vector<16x128xf32> to vector<1x128xf32>
    %8 = vector.extract_strided_slice %1 {offsets = [6, 0], sizes = [1, 128], strides = [1, 1]} : vector<16x128xf32> to vector<1x128xf32>
    %9 = vector.extract_strided_slice %1 {offsets = [7, 0], sizes = [1, 128], strides = [1, 1]} : vector<16x128xf32> to vector<1x128xf32>
    %10 = vector.extract_strided_slice %1 {offsets = [8, 0], sizes = [1, 128], strides = [1, 1]} : vector<16x128xf32> to vector<1x128xf32>
    %11 = vector.extract_strided_slice %1 {offsets = [9, 0], sizes = [1, 64], strides = [1, 1]} : vector<16x128xf32> to vector<1x64xf32>
    %12 = vector.extract_strided_slice %1 {offsets = [10, 0], sizes = [1, 64], strides = [1, 1]} : vector<16x128xf32> to vector<1x64xf32>
    %13 = vector.extract_strided_slice %1 {offsets = [11, 0], sizes = [1, 64], strides = [1, 1]} : vector<16x128xf32> to vector<1x64xf32>
    %14 = vector.extract_strided_slice %1 {offsets = [12, 0], sizes = [1, 32], strides = [1, 1]} : vector<16x128xf32> to vector<1x32xf32>
    %15 = vector.extract_strided_slice %1 {offsets = [13, 0], sizes = [1, 32], strides = [1, 1]} : vector<16x128xf32> to vector<1x32xf32>
    %16 = vector.extract_strided_slice %1 {offsets = [14, 0], sizes = [1, 32], strides = [1, 1]} : vector<16x128xf32> to vector<1x32xf32>
    %17 = vector.extract_strided_slice %1 {offsets = [15, 0], sizes = [1, 1], strides = [1, 1]} : vector<16x128xf32> to vector<1x1xf32>
    %c0_3 = arith.constant 0 : index
    %c0_4 = arith.constant 0 : index
    %c0_5 = arith.constant 0 : index
    %18 = vector.load %arg3[%c0_3, %c0_4, %c0_5] : memref<4x128x128xf32, #tpu.memory_space<vmem>>, vector<1x128x128xf32>
    %19 = vector.shape_cast %18 : vector<1x128x128xf32> to vector<128x128xf32>
    %20 = vector.extract_strided_slice %19 {offsets = [0, 0], sizes = [64, 128], strides = [1, 1]} : vector<128x128xf32> to vector<64x128xf32>
    %c1 = arith.constant 1 : index
    %c0_6 = arith.constant 0 : index
    %c0_7 = arith.constant 0 : index
    %21 = vector.load %arg3[%c1, %c0_6, %c0_7] : memref<4x128x128xf32, #tpu.memory_space<vmem>>, vector<1x128x128xf32>
    %22 = vector.shape_cast %21 : vector<1x128x128xf32> to vector<128x128xf32>
    %23 = vector.extract_strided_slice %22 {offsets = [0, 0], sizes = [128, 64], strides = [1, 1]} : vector<128x128xf32> to vector<128x64xf32>
    %c2 = arith.constant 2 : index
    %c0_8 = arith.constant 0 : index
    %c0_9 = arith.constant 0 : index
    %24 = vector.load %arg3[%c2, %c0_8, %c0_9] : memref<4x128x128xf32, #tpu.memory_space<vmem>>, vector<1x128x128xf32>
    %25 = vector.shape_cast %24 : vector<1x128x128xf32> to vector<128x128xf32>
    %26 = vector.extract_strided_slice %25 {offsets = [0, 0], sizes = [64, 32], strides = [1, 1]} : vector<128x128xf32> to vector<64x32xf32>
    %c3 = arith.constant 3 : index
    %c0_10 = arith.constant 0 : index
    %c0_11 = arith.constant 0 : index
    %27 = vector.load %arg3[%c3, %c0_10, %c0_11] : memref<4x128x128xf32, #tpu.memory_space<vmem>>, vector<1x128x128xf32>
    %28 = vector.shape_cast %27 : vector<1x128x128xf32> to vector<128x128xf32>
    %29 = vector.extract_strided_slice %28 {offsets = [0, 0], sizes = [32, 1], strides = [1, 1]} : vector<128x128xf32> to vector<32x1xf32>
    %cst = arith.constant dense<0.000000e+00> : vector<16x128xf32>
    %30 = tpu.matmul %0, %20, %cst {dimension_numbers = #tpu.dot_dimension_numbers<[1], [0], [0], [1], [0, 0, 1, 1], [], []>} : vector<16x64xf32>, vector<64x128xf32>, vector<16x128xf32> -> vector<16x128xf32>
    %31 = vector.broadcast %2 : vector<1x128xf32> to vector<16x128xf32>
    %32 = arith.addf %30, %31 : vector<16x128xf32>
    %cst_12 = arith.constant dense<0.000000e+00> : vector<16xf32>
    %33 = vector.multi_reduction <add>, %32, %cst_12 [1] : vector<16x128xf32> to vector<16xf32>
    %34 = vector.shape_cast %33 : vector<16xf32> to vector<16x1xf32>
    %35 = arith.mulf %32, %32 : vector<16x128xf32>
    %cst_13 = arith.constant dense<0.000000e+00> : vector<16xf32>
    %36 = vector.multi_reduction <add>, %35, %cst_13 [1] : vector<16x128xf32> to vector<16xf32>
    %37 = vector.shape_cast %36 : vector<16xf32> to vector<16x1xf32>
    %cst_14 = arith.constant 7.812500e-03 : f32
    %38 = vector.broadcast %cst_14 : f32 to vector<16x1xf32>
    %39 = arith.mulf %34, %38 : vector<16x1xf32>
    %cst_15 = arith.constant 7.812500e-03 : f32
    %40 = vector.broadcast %cst_15 : f32 to vector<16x1xf32>
    %41 = arith.mulf %37, %40 : vector<16x1xf32>
    %42 = arith.mulf %39, %39 : vector<16x1xf32>
    %43 = arith.subf %41, %42 : vector<16x1xf32>
    %cst_16 = arith.constant 9.99999974E-6 : f32
    %44 = vector.broadcast %cst_16 : f32 to vector<16x1xf32>
    %45 = arith.addf %43, %44 : vector<16x1xf32>
    %46 = math.rsqrt %45 : vector<16x1xf32>
    %47 = vector.broadcast %39 : vector<16x1xf32> to vector<16x128xf32>
    %48 = arith.subf %32, %47 : vector<16x128xf32>
    %49 = vector.broadcast %46 : vector<16x1xf32> to vector<16x128xf32>
    %50 = arith.mulf %48, %49 : vector<16x128xf32>
    %51 = vector.broadcast %3 : vector<1x128xf32> to vector<16x128xf32>
    %52 = arith.mulf %50, %51 : vector<16x128xf32>
    %53 = vector.broadcast %4 : vector<1x128xf32> to vector<16x128xf32>
    %54 = arith.addf %52, %53 : vector<16x128xf32>
    %cst_17 = arith.constant 5.000000e-01 : f32
    %55 = vector.broadcast %cst_17 : f32 to vector<16x128xf32>
    %56 = arith.mulf %55, %54 : vector<16x128xf32>
    %cst_18 = arith.constant 0.707106769 : f32
    %57 = vector.broadcast %cst_18 : f32 to vector<16x128xf32>
    %58 = arith.mulf %54, %57 : vector<16x128xf32>
    %59 = math.erf %58 : vector<16x128xf32>
    %cst_19 = arith.constant 1.000000e+00 : f32
    %60 = vector.broadcast %cst_19 : f32 to vector<16x128xf32>
    %61 = arith.addf %60, %59 : vector<16x128xf32>
    %62 = arith.mulf %56, %61 : vector<16x128xf32>
    %cst_20 = arith.constant dense<0.000000e+00> : vector<16xf32>
    %63 = vector.multi_reduction <add>, %62, %cst_20 [1] : vector<16x128xf32> to vector<16xf32>
    %64 = vector.shape_cast %63 : vector<16xf32> to vector<16x1xf32>
    %65 = arith.mulf %62, %62 : vector<16x128xf32>
    %cst_21 = arith.constant dense<0.000000e+00> : vector<16xf32>
    %66 = vector.multi_reduction <add>, %65, %cst_21 [1] : vector<16x128xf32> to vector<16xf32>
    %67 = vector.shape_cast %66 : vector<16xf32> to vector<16x1xf32>
    %cst_22 = arith.constant 7.812500e-03 : f32
    %68 = vector.broadcast %cst_22 : f32 to vector<16x1xf32>
    %69 = arith.mulf %64, %68 : vector<16x1xf32>
    %cst_23 = arith.constant 7.812500e-03 : f32
    %70 = vector.broadcast %cst_23 : f32 to vector<16x1xf32>
    %71 = arith.mulf %67, %70 : vector<16x1xf32>
    %72 = arith.mulf %69, %69 : vector<16x1xf32>
    %73 = arith.subf %71, %72 : vector<16x1xf32>
    %cst_24 = arith.constant 9.99999974E-6 : f32
    %74 = vector.broadcast %cst_24 : f32 to vector<16x1xf32>
    %75 = arith.addf %73, %74 : vector<16x1xf32>
    %76 = math.rsqrt %75 : vector<16x1xf32>
    %77 = vector.broadcast %69 : vector<16x1xf32> to vector<16x128xf32>
    %78 = arith.subf %62, %77 : vector<16x128xf32>
    %79 = vector.broadcast %76 : vector<16x1xf32> to vector<16x128xf32>
    %80 = arith.mulf %78, %79 : vector<16x128xf32>
    %c0_25 = arith.constant 0 : index
    %c0_26 = arith.constant 0 : index
    %c0_27 = arith.constant 0 : index
    %81 = vector.load %arg2[%c0_25, %c0_26, %c0_27] : memref<4x128x128xf32, #tpu.memory_space<vmem>>, vector<1x128x128xf32>
    %82 = vector.shape_cast %81 : vector<1x128x128xf32> to vector<128x128xf32>
    %cst_28 = arith.constant dense<0.000000e+00> : vector<16x128xf32>
    %83 = tpu.matmul %80, %82, %cst_28 {dimension_numbers = #tpu.dot_dimension_numbers<[1], [0], [0], [1], [0, 0, 1, 1], [], []>} : vector<16x128xf32>, vector<128x128xf32>, vector<16x128xf32> -> vector<16x128xf32>
    %84 = vector.broadcast %5 : vector<1x128xf32> to vector<16x128xf32>
    %85 = arith.addf %83, %84 : vector<16x128xf32>
    %cst_29 = arith.constant 5.000000e-01 : f32
    %86 = vector.broadcast %cst_29 : f32 to vector<16x128xf32>
    %87 = arith.mulf %86, %85 : vector<16x128xf32>
    %cst_30 = arith.constant 0.707106769 : f32
    %88 = vector.broadcast %cst_30 : f32 to vector<16x128xf32>
    %89 = arith.mulf %85, %88 : vector<16x128xf32>
    %90 = math.erf %89 : vector<16x128xf32>
    %cst_31 = arith.constant 1.000000e+00 : f32
    %91 = vector.broadcast %cst_31 : f32 to vector<16x128xf32>
    %92 = arith.addf %91, %90 : vector<16x128xf32>
    %93 = arith.mulf %87, %92 : vector<16x128xf32>
    %c1_32 = arith.constant 1 : index
    %c0_33 = arith.constant 0 : index
    %c0_34 = arith.constant 0 : index
    %94 = vector.load %arg2[%c1_32, %c0_33, %c0_34] : memref<4x128x128xf32, #tpu.memory_space<vmem>>, vector<1x128x128xf32>
    %95 = vector.shape_cast %94 : vector<1x128x128xf32> to vector<128x128xf32>
    %cst_35 = arith.constant dense<0.000000e+00> : vector<16x128xf32>
    %96 = tpu.matmul %93, %95, %cst_35 {dimension_numbers = #tpu.dot_dimension_numbers<[1], [0], [0], [1], [0, 0, 1, 1], [], []>} : vector<16x128xf32>, vector<128x128xf32>, vector<16x128xf32> -> vector<16x128xf32>
    %97 = vector.broadcast %6 : vector<1x128xf32> to vector<16x128xf32>
    %98 = arith.addf %96, %97 : vector<16x128xf32>
    %cst_36 = arith.constant 5.000000e-01 : f32
    %99 = vector.broadcast %cst_36 : f32 to vector<16x128xf32>
    %100 = arith.mulf %99, %98 : vector<16x128xf32>
    %cst_37 = arith.constant 0.707106769 : f32
    %101 = vector.broadcast %cst_37 : f32 to vector<16x128xf32>
    %102 = arith.mulf %98, %101 : vector<16x128xf32>
    %103 = math.erf %102 : vector<16x128xf32>
    %cst_38 = arith.constant 1.000000e+00 : f32
    %104 = vector.broadcast %cst_38 : f32 to vector<16x128xf32>
    %105 = arith.addf %104, %103 : vector<16x128xf32>
    %106 = arith.mulf %100, %105 : vector<16x128xf32>
    %c2_39 = arith.constant 2 : index
    %c0_40 = arith.constant 0 : index
    %c0_41 = arith.constant 0 : index
    %107 = vector.load %arg2[%c2_39, %c0_40, %c0_41] : memref<4x128x128xf32, #tpu.memory_space<vmem>>, vector<1x128x128xf32>
    %108 = vector.shape_cast %107 : vector<1x128x128xf32> to vector<128x128xf32>
    %cst_42 = arith.constant dense<0.000000e+00> : vector<16x128xf32>
    %109 = tpu.matmul %106, %108, %cst_42 {dimension_numbers = #tpu.dot_dimension_numbers<[1], [0], [0], [1], [0, 0, 1, 1], [], []>} : vector<16x128xf32>, vector<128x128xf32>, vector<16x128xf32> -> vector<16x128xf32>
    %110 = vector.broadcast %7 : vector<1x128xf32> to vector<16x128xf32>
    %111 = arith.addf %109, %110 : vector<16x128xf32>
    %112 = arith.addf %62, %111 : vector<16x128xf32>
    %c3_43 = arith.constant 3 : index
    %c0_44 = arith.constant 0 : index
    %c0_45 = arith.constant 0 : index
    %113 = vector.load %arg2[%c3_43, %c0_44, %c0_45] : memref<4x128x128xf32, #tpu.memory_space<vmem>>, vector<1x128x128xf32>
    %114 = vector.shape_cast %113 : vector<1x128x128xf32> to vector<128x128xf32>
    %cst_46 = arith.constant dense<0.000000e+00> : vector<16x128xf32>
    %115 = tpu.matmul %112, %114, %cst_46 {dimension_numbers = #tpu.dot_dimension_numbers<[1], [0], [0], [1], [0, 0, 1, 1], [], []>} : vector<16x128xf32>, vector<128x128xf32>, vector<16x128xf32> -> vector<16x128xf32>
    %116 = vector.broadcast %8 : vector<1x128xf32> to vector<16x128xf32>
    %117 = arith.addf %115, %116 : vector<16x128xf32>
    %cst_47 = arith.constant dense<0.000000e+00> : vector<16xf32>
    %118 = vector.multi_reduction <add>, %117, %cst_47 [1] : vector<16x128xf32> to vector<16xf32>
    %119 = vector.shape_cast %118 : vector<16xf32> to vector<16x1xf32>
    %120 = arith.mulf %117, %117 : vector<16x128xf32>
    %cst_48 = arith.constant dense<0.000000e+00> : vector<16xf32>
    %121 = vector.multi_reduction <add>, %120, %cst_48 [1] : vector<16x128xf32> to vector<16xf32>
    %122 = vector.shape_cast %121 : vector<16xf32> to vector<16x1xf32>
    %cst_49 = arith.constant 7.812500e-03 : f32
    %123 = vector.broadcast %cst_49 : f32 to vector<16x1xf32>
    %124 = arith.mulf %119, %123 : vector<16x1xf32>
    %cst_50 = arith.constant 7.812500e-03 : f32
    %125 = vector.broadcast %cst_50 : f32 to vector<16x1xf32>
    %126 = arith.mulf %122, %125 : vector<16x1xf32>
    %127 = arith.mulf %124, %124 : vector<16x1xf32>
    %128 = arith.subf %126, %127 : vector<16x1xf32>
    %cst_51 = arith.constant 9.99999974E-6 : f32
    %129 = vector.broadcast %cst_51 : f32 to vector<16x1xf32>
    %130 = arith.addf %128, %129 : vector<16x1xf32>
    %131 = math.rsqrt %130 : vector<16x1xf32>
    %132 = vector.broadcast %124 : vector<16x1xf32> to vector<16x128xf32>
    %133 = arith.subf %117, %132 : vector<16x128xf32>
    %134 = vector.broadcast %131 : vector<16x1xf32> to vector<16x128xf32>
    %135 = arith.mulf %133, %134 : vector<16x128xf32>
    %136 = vector.broadcast %9 : vector<1x128xf32> to vector<16x128xf32>
    %137 = arith.mulf %135, %136 : vector<16x128xf32>
    %138 = vector.broadcast %10 : vector<1x128xf32> to vector<16x128xf32>
    %139 = arith.addf %137, %138 : vector<16x128xf32>
    %cst_52 = arith.constant 5.000000e-01 : f32
    %140 = vector.broadcast %cst_52 : f32 to vector<16x128xf32>
    %141 = arith.mulf %140, %139 : vector<16x128xf32>
    %cst_53 = arith.constant 0.707106769 : f32
    %142 = vector.broadcast %cst_53 : f32 to vector<16x128xf32>
    %143 = arith.mulf %139, %142 : vector<16x128xf32>
    %144 = math.erf %143 : vector<16x128xf32>
    %cst_54 = arith.constant 1.000000e+00 : f32
    %145 = vector.broadcast %cst_54 : f32 to vector<16x128xf32>
    %146 = arith.addf %145, %144 : vector<16x128xf32>
    %147 = arith.mulf %141, %146 : vector<16x128xf32>
    %cst_55 = arith.constant dense<0.000000e+00> : vector<16x64xf32>
    %148 = tpu.matmul %147, %23, %cst_55 {dimension_numbers = #tpu.dot_dimension_numbers<[1], [0], [0], [1], [0, 0, 1, 1], [], []>} : vector<16x128xf32>, vector<128x64xf32>, vector<16x64xf32> -> vector<16x64xf32>
    %149 = vector.broadcast %11 : vector<1x64xf32> to vector<16x64xf32>
    %150 = arith.addf %148, %149 : vector<16x64xf32>
    %cst_56 = arith.constant dense<0.000000e+00> : vector<16xf32>
    %151 = vector.multi_reduction <add>, %150, %cst_56 [1] : vector<16x64xf32> to vector<16xf32>
    %152 = vector.shape_cast %151 : vector<16xf32> to vector<16x1xf32>
    %153 = arith.mulf %150, %150 : vector<16x64xf32>
    %cst_57 = arith.constant dense<0.000000e+00> : vector<16xf32>
    %154 = vector.multi_reduction <add>, %153, %cst_57 [1] : vector<16x64xf32> to vector<16xf32>
    %155 = vector.shape_cast %154 : vector<16xf32> to vector<16x1xf32>
    %cst_58 = arith.constant 1.562500e-02 : f32
    %156 = vector.broadcast %cst_58 : f32 to vector<16x1xf32>
    %157 = arith.mulf %152, %156 : vector<16x1xf32>
    %cst_59 = arith.constant 1.562500e-02 : f32
    %158 = vector.broadcast %cst_59 : f32 to vector<16x1xf32>
    %159 = arith.mulf %155, %158 : vector<16x1xf32>
    %160 = arith.mulf %157, %157 : vector<16x1xf32>
    %161 = arith.subf %159, %160 : vector<16x1xf32>
    %cst_60 = arith.constant 9.99999974E-6 : f32
    %162 = vector.broadcast %cst_60 : f32 to vector<16x1xf32>
    %163 = arith.addf %161, %162 : vector<16x1xf32>
    %164 = math.rsqrt %163 : vector<16x1xf32>
    %165 = vector.broadcast %157 : vector<16x1xf32> to vector<16x64xf32>
    %166 = arith.subf %150, %165 : vector<16x64xf32>
    %167 = vector.broadcast %164 : vector<16x1xf32> to vector<16x64xf32>
    %168 = arith.mulf %166, %167 : vector<16x64xf32>
    %169 = vector.broadcast %12 : vector<1x64xf32> to vector<16x64xf32>
    %170 = arith.mulf %168, %169 : vector<16x64xf32>
    %171 = vector.broadcast %13 : vector<1x64xf32> to vector<16x64xf32>
    %172 = arith.addf %170, %171 : vector<16x64xf32>
    %cst_61 = arith.constant 5.000000e-01 : f32
    %173 = vector.broadcast %cst_61 : f32 to vector<16x64xf32>
    %174 = arith.mulf %173, %172 : vector<16x64xf32>
    %cst_62 = arith.constant 0.707106769 : f32
    %175 = vector.broadcast %cst_62 : f32 to vector<16x64xf32>
    %176 = arith.mulf %172, %175 : vector<16x64xf32>
    %177 = math.erf %176 : vector<16x64xf32>
    %cst_63 = arith.constant 1.000000e+00 : f32
    %178 = vector.broadcast %cst_63 : f32 to vector<16x64xf32>
    %179 = arith.addf %178, %177 : vector<16x64xf32>
    %180 = arith.mulf %174, %179 : vector<16x64xf32>
    %cst_64 = arith.constant dense<0.000000e+00> : vector<16x32xf32>
    %181 = tpu.matmul %180, %26, %cst_64 {dimension_numbers = #tpu.dot_dimension_numbers<[1], [0], [0], [1], [0, 0, 1, 1], [], []>} : vector<16x64xf32>, vector<64x32xf32>, vector<16x32xf32> -> vector<16x32xf32>
    %182 = vector.broadcast %14 : vector<1x32xf32> to vector<16x32xf32>
    %183 = arith.addf %181, %182 : vector<16x32xf32>
    %cst_65 = arith.constant dense<0.000000e+00> : vector<16xf32>
    %184 = vector.multi_reduction <add>, %183, %cst_65 [1] : vector<16x32xf32> to vector<16xf32>
    %185 = vector.shape_cast %184 : vector<16xf32> to vector<16x1xf32>
    %186 = arith.mulf %183, %183 : vector<16x32xf32>
    %cst_66 = arith.constant dense<0.000000e+00> : vector<16xf32>
    %187 = vector.multi_reduction <add>, %186, %cst_66 [1] : vector<16x32xf32> to vector<16xf32>
    %188 = vector.shape_cast %187 : vector<16xf32> to vector<16x1xf32>
    %cst_67 = arith.constant 3.125000e-02 : f32
    %189 = vector.broadcast %cst_67 : f32 to vector<16x1xf32>
    %190 = arith.mulf %185, %189 : vector<16x1xf32>
    %cst_68 = arith.constant 3.125000e-02 : f32
    %191 = vector.broadcast %cst_68 : f32 to vector<16x1xf32>
    %192 = arith.mulf %188, %191 : vector<16x1xf32>
    %193 = arith.mulf %190, %190 : vector<16x1xf32>
    %194 = arith.subf %192, %193 : vector<16x1xf32>
    %cst_69 = arith.constant 9.99999974E-6 : f32
    %195 = vector.broadcast %cst_69 : f32 to vector<16x1xf32>
    %196 = arith.addf %194, %195 : vector<16x1xf32>
    %197 = math.rsqrt %196 : vector<16x1xf32>
    %198 = vector.broadcast %190 : vector<16x1xf32> to vector<16x32xf32>
    %199 = arith.subf %183, %198 : vector<16x32xf32>
    %200 = vector.broadcast %197 : vector<16x1xf32> to vector<16x32xf32>
    %201 = arith.mulf %199, %200 : vector<16x32xf32>
    %202 = vector.broadcast %15 : vector<1x32xf32> to vector<16x32xf32>
    %203 = arith.mulf %201, %202 : vector<16x32xf32>
    %204 = vector.broadcast %16 : vector<1x32xf32> to vector<16x32xf32>
    %205 = arith.addf %203, %204 : vector<16x32xf32>
    %cst_70 = arith.constant 5.000000e-01 : f32
    %206 = vector.broadcast %cst_70 : f32 to vector<16x32xf32>
    %207 = arith.mulf %206, %205 : vector<16x32xf32>
    %cst_71 = arith.constant 0.707106769 : f32
    %208 = vector.broadcast %cst_71 : f32 to vector<16x32xf32>
    %209 = arith.mulf %205, %208 : vector<16x32xf32>
    %210 = math.erf %209 : vector<16x32xf32>
    %cst_72 = arith.constant 1.000000e+00 : f32
    %211 = vector.broadcast %cst_72 : f32 to vector<16x32xf32>
    %212 = arith.addf %211, %210 : vector<16x32xf32>
    %213 = arith.mulf %207, %212 : vector<16x32xf32>
    %cst_73 = arith.constant dense<0.000000e+00> : vector<16x1xf32>
    %214 = tpu.matmul %213, %29, %cst_73 {dimension_numbers = #tpu.dot_dimension_numbers<[1], [0], [0], [1], [0, 0, 1, 1], [], []>} : vector<16x32xf32>, vector<32x1xf32>, vector<16x1xf32> -> vector<16x1xf32>
    %215 = vector.broadcast %17 : vector<1x1xf32> to vector<16x1xf32>
    %216 = arith.addf %214, %215 : vector<16x1xf32>
    %217 = math.tanh %216 : vector<16x1xf32>
    %cst_74 = arith.constant 1.000000e+00 : f32
    %218 = vector.broadcast %cst_74 : f32 to vector<16x1xf32>
    %219 = arith.addf %217, %218 : vector<16x1xf32>
    %cst_75 = arith.constant 5.000000e-01 : f32
    %220 = vector.broadcast %cst_75 : f32 to vector<16x1xf32>
    %221 = arith.mulf %219, %220 : vector<16x1xf32>
    %c0_76 = arith.constant 0 : index
    %c0_77 = arith.constant 0 : index
    %222 = vector.load %arg5[%c0_76, %c0_77] : memref<16x1xf32, #tpu.memory_space<vmem>>, vector<16x1xf32>
    tpu.vector_store %arg5[%c0_76, %c0_77], %221 {strides = array<i32>} : memref<16x1xf32, #tpu.memory_space<vmem>>, vector<16x1xf32>,
    return
  }
  func.func @transform_0(%arg0: i32) -> (i32, i32) {
    %c0_i32 = arith.constant 0 : i32
    %c0_i32_0 = arith.constant 0 : i32
    return %arg0, %c0_i32 : i32, i32
  }
  func.func @transform_1(%arg0: i32) -> (i32, i32, i32) {
    %c0_i32 = arith.constant 0 : i32
    %c0_i32_0 = arith.constant 0 : i32
    %c0_i32_1 = arith.constant 0 : i32
    %c0_i32_2 = arith.constant 0 : i32
    return %c0_i32, %c0_i32_0, %c0_i32_1 : i32, i32, i32
  }
  func.func @transform_2(%arg0: i32) -> (i32, i32, i32) {
    %c0_i32 = arith.constant 0 : i32
    %c0_i32_0 = arith.constant 0 : i32
    %c0_i32_1 = arith.constant 0 : i32
    %c0_i32_2 = arith.constant 0 : i32
    return %c0_i32, %c0_i32_0, %c0_i32_1 : i32, i32, i32
  }
  func.func @transform_3(%arg0: i32) -> (i32, i32) {
    %c0_i32 = arith.constant 0 : i32
    %c0_i32_0 = arith.constant 0 : i32
    %c0_i32_1 = arith.constant 0 : i32
    return %c0_i32, %c0_i32_0 : i32, i32
  }
  func.func @transform_4(%arg0: i32) -> (i32, i32) {
    %c0_i32 = arith.constant 0 : i32
    %c0_i32_0 = arith.constant 0 : i32
    return %arg0, %c0_i32 : i32, i32
  }
}

</mosaic_0001>

<bundles_post_ra>
// kernel: _lambda_.1
= control target key start
LH: loop header
LB: loop body
LE: loop exit
PB: predicated region body
PF: predicated region fallthrough
CT: control target
= control target key end

     0   :  { %9 = vsyncpa [#allocation3], 0  ;;  %s2005_s0 = inlined_call_operand.hbm [shape: f32[16,64], index: 0, kind: input, shape index: {}]   ;;  %s2006_s1 = inlined_call_operand.hbm [shape: f32[4,128,128], index: 1, kind: input, shape index: {}]   ;;  %s2007_s2 = inlined_call_operand.hbm [shape: f32[4,128,128], index: 2, kind: input, shape index: {}]   ;;  %s2008_s3 = inlined_call_operand.hbm [shape: f32[16,128], index: 3, kind: input, shape index: {}]   ;;  %s2009_s4 = inlined_call_operand.vmem [shape: f32[16,1], index: 4, kind: output, shape index: {}]  }
   0x1   :  { %10 = vsyncpa [#allocation5], 0 }
   0x2   :  { %11 = vsyncpa [#allocation8], 0  ;;  %s1792_s15 = smov [#allocation4]   ;;  %s1793_s17 = smov [#allocation2]  }
   0x3   :  { %s29_s16 = sshll.u32 %s1792_s15, 4  ;;  %s17_s18 = sshll.u32 %s1793_s17, 4  ;;  %s30_s16 = int_to_ptr.vmem [resolvable:$true] %s29_s16  ;;  %s1823_s18 = int_to_ptr.vmem [resolvable:$true] %s17_s18 }
   0x4   :  { %s1698_s21 = scalar_lea.hbm %s2006_s1, 8192 }
   0x5   :  { %p1699_p0 = scmp.ne.s32.totalorder %s2006_s1, %s1698_s21  ;;  %p1702_p1 = scmp.lt.u32.totalorder %s1698_s21, %s2006_s1 }
   0x7   :  { %p1704_p2 = pnand %p1702_p1, %p1699_p0 }
   0x9   :  { %1707 = shalt.err (!%p1704_p2)
}
   0xa   :  { %s1708_s26 = scalar_lea.vmem %s30_s16, 8192  ;;  %p1713_p4 = scmp.lt.s32.totalorder %s30_s16, %s30_s16 }
   0xb   :  { %p1709_p3 = scmp.ne.s32.totalorder %s30_s16, %s1708_s26  ;;  %p1714_p5 = scmp.lt.s32.totalorder %s1708_s26, %s1708_s26 }
   0xd   :  { %p1715_p6 = por %p1714_p5, %p1713_p4 }
   0xf   :  { %p1716_p7 = pnand %p1715_p6, %p1709_p3 }
  0x11   :  { %1719 = shalt.err (!%p1716_p7)
}
  0x12   :  { %s1794_s27 = smov 128   ;;  %s1795_s28 = smov 8  }
  0x13   :  { %35 = dma.hbm_to_vmem [thread:$0]  %s2006_s1, 8192, %s30_s16, [#allocation5], %s1794_s27, %s1794_s27, %s1795_s28  }
  0x14   :  { %s1720_s7 = scalar_lea.hbm %s2005_s0, 256 }
  0x15   :  { %p1721_p8 = scmp.ne.s32.totalorder %s2005_s0, %s1720_s7  ;;  %p1724_p9 = scmp.lt.u32.totalorder %s1720_s7, %s2005_s0 }
  0x17   :  { %p1726_p10 = pnand %p1724_p9, %p1721_p8 }
  0x19   :  { %1729 = shalt.err (!%p1726_p10)
}
  0x1a   :  { %s1730_s12 = scalar_lea.vmem %s1823_s18, 256  ;;  %p1735_p12 = scmp.lt.s32.totalorder %s1823_s18, %s1823_s18 }
  0x1b   :  { %p1731_p11 = scmp.ne.s32.totalorder %s1823_s18, %s1730_s12  ;;  %p1736_p13 = scmp.lt.s32.totalorder %s1730_s12, %s1730_s12 }
  0x1d   :  { %p1737_p0 = por %p1736_p13, %p1735_p12 }
  0x1f   :  { %p1738_p1 = pnand %p1737_p0, %p1731_p11 }
  0x21   :  { %1741 = shalt.err (!%p1738_p1)
}
  0x22   :  { %23 = dma.hbm_to_vmem [thread:$0]  %s2005_s0, 256, %s1823_s18, [#allocation3], %s1794_s27, %s1794_s27, %s1795_s28  }
  0x23   :  { %s1796_s14 = smov [#allocation6]   ;;  %s1797_s16 = smov [#allocation7]  }
  0x24   :  { %s41_s15 = sshll.u32 %s1796_s14, 4  ;;  %s53_s17 = sshll.u32 %s1797_s16, 4  ;;  %s42_s15 = int_to_ptr.vmem [resolvable:$true] %s41_s15  ;;  %s1860_s17 = int_to_ptr.vmem [resolvable:$true] %s53_s17 }
  0x25   :  { %s1742_s21 = scalar_lea.hbm %s2007_s2, 8192 }
  0x26   :  { %p1743_p2 = scmp.ne.s32.totalorder %s2007_s2, %s1742_s21  ;;  %p1746_p3 = scmp.lt.u32.totalorder %s1742_s21, %s2007_s2 }
  0x28   :  { %p1748_p4 = pnand %p1746_p3, %p1743_p2 }
  0x2a   :  { %1751 = shalt.err (!%p1748_p4)
}
  0x2b   :  { %s1752_s0 = scalar_lea.vmem %s42_s15, 8192  ;;  %p1757_p6 = scmp.lt.s32.totalorder %s42_s15, %s42_s15 }
  0x2c   :  { %p1753_p5 = scmp.ne.s32.totalorder %s42_s15, %s1752_s0  ;;  %p1758_p7 = scmp.lt.s32.totalorder %s1752_s0, %s1752_s0 }
  0x2e   :  { %p1759_p8 = por %p1758_p7, %p1757_p6 }
  0x30   :  { %p1760_p9 = pnand %p1759_p8, %p1753_p5 }
  0x32   :  { %1763 = shalt.err (!%p1760_p9)
}
  0x33   :  { %47 = dma.hbm_to_vmem [thread:$0]  %s2007_s2, 8192, %s42_s15, [#allocation5], %s1794_s27, %s1794_s27, %s1795_s28  }
  0x34   :  { %s1764_s5 = scalar_lea.hbm %s2008_s3, 256 }
  0x35   :  { %p1765_p10 = scmp.ne.s32.totalorder %s2008_s3, %s1764_s5  ;;  %p1768_p11 = scmp.lt.u32.totalorder %s1764_s5, %s2008_s3 }
  0x37   :  { %p1770_p12 = pnand %p1768_p11, %p1765_p10 }
  0x39   :  { %1773 = shalt.err (!%p1770_p12)
}
  0x3a   :  { %s1774_s10 = scalar_lea.vmem %s1860_s17, 256  ;;  %p1779_p0 = scmp.lt.s32.totalorder %s1860_s17, %s1860_s17 }
  0x3b   :  { %p1775_p13 = scmp.ne.s32.totalorder %s1860_s17, %s1774_s10  ;;  %p1780_p1 = scmp.lt.s32.totalorder %s1774_s10, %s1774_s10 }
  0x3d   :  { %p1781_p2 = por %p1780_p1, %p1779_p0 }
  0x3f   :  { %p1782_p3 = pnand %p1781_p2, %p1775_p13 }
  0x41   :  { %1785 = shalt.err (!%p1782_p3)
}
  0x42   :  { %59 = dma.hbm_to_vmem [thread:$0]  %s2008_s3, 256, %s1860_s17, [#allocation8], %s1794_s27, %s1794_s27, %s1795_s28  }
  0x43   :  { %1786 = dma.done.wait [#allocation3], 256  }
  0x44   :  { %1787 = vsyncadd [#allocation3], 4294967040 }
  0x45   :  { %1788 = dma.done.wait [#allocation5], 16384  }
  0x46   :  { %1789 = vsyncadd [#allocation5], 4294950912 }
  0x47   :  { %1790 = dma.done.wait [#allocation8], 256  }
  0x48   :  { %1791 = vsyncadd [#allocation8], 4294967040  ;;  %v76_v0 = vld [vmem:[#allocation6] sm:$0xff]  ;;  %v77_v1 = vld [vmem:[#allocation6 + $0x8] sm:$0xff]  ;;  %vm119_vm0 = vcmask 523264   ;;  %v115_v14 = vlaneseq  ;;  %vm944_vm1 = vcmask 261120  }
  0x49   :  { %v78_v2 = vld [vmem:[#allocation6 + $0x10] sm:$0xff]  ;;  %v1444_v3 = vpack.c.bf16 %v77_v1, %v76_v0  ;;  %v79_v4 = vld [vmem:[#allocation6 + $0x18] sm:$0xff]  ;;  %v80_v6 = vld [vmem:[#allocation6 + $0x20] sm:$0xff]  ;;  %vm1088_vm2 = vcmask 7168  }
  0x4a   :  { %v1448_v5 = vpack.c.bf16 %v79_v4, %v78_v2  ;;  %v81_v7 = vld [vmem:[#allocation6 + $0x28] sm:$0xff]  ;;  %v72_v8 = vld [vmem:[#allocation2] sm:$0xff]  ;;  %v83_v11 = vld [vmem:[#allocation6 + $0x38] sm:$0xff]  ;;  %v1899_v15 = vshrl.u32 %v115_v14, 7 }
  0x4b   :  { %1445 = vmatprep.subr.bf16.mxu0 %v1444_v3  ;;  %1236 = vmatprep.mubr.msk.f32.mxu0 %vm119_vm0, %v72_v8  ;;  %v1452_v9 = vpack.c.bf16 %v81_v7, %v80_v6  ;;  %v82_v10 = vld [vmem:[#allocation6 + $0x30] sm:$0xff]  ;;  %v73_v13 = vld [vmem:[#allocation2 + $0x8] sm:$0xff]  ;;  %v1902_v17 = vld [vmem:[#allocation7] sm:$0xff] }
  0x4c   :  { %1447 = vmatpush3.bf16.msra.mxu0 %v1444_v3  ;;  %v1456_v12 = vpack.c.bf16 %v83_v11, %v82_v10  ;;  %v117_v16 = vsub.s32 0, %v1899_v15  ;;  %v275_v25 = vld [vmem:[#allocation4] sm:$0xff]  ;;  %v276_v26 = vld [vmem:[#allocation4 + $0x8] sm:$0xff]  ;;  %v277_v27 = vld [vmem:[#allocation4 + $0x10] sm:$0xff]  ;;  %v229_v45 = vsub.s32 1, %v1899_v15  ;;  %v235_v46 = vsub.s32 2, %v1899_v15 }
  0x4d   :  { %1449 = vmatprep.subr.bf16.mxu0 %v1448_v5  ;;  %v1460_v28 = vpack.c.bf16 %v276_v26, %v275_v25  ;;  %v278_v29 = vld [vmem:[#allocation4 + $0x18] sm:$0xff]  ;;  %v279_v7 = vld [vmem:[#allocation4 + $0x20] sm:$0xff]  ;;  %v280_v8 = vld [vmem:[#allocation4 + $0x28] sm:$0xff] }
  0x4e   :  { %v118_v18 = vrot.slane %v1902_v17, %v117_v16  ;;  %v1464_v30 = vpack.c.bf16 %v278_v29, %v277_v27  ;;  %v230_v48 = vrot.slane %v1902_v17, %v229_v45  ;;  %v236_v51 = vrot.slane %v1902_v17, %v235_v46  ;;  %v281_v10 = vld [vmem:[#allocation4 + $0x30] sm:$0xff]  ;;  %v282_v11 = vld [vmem:[#allocation4 + $0x38] sm:$0xff]  ;;  %v284_v14 = vld [vmem:[#allocation4 + $0x48] sm:$0xff] }
  0x4f   :  { %1461 = vmatprep.subr.bf16.mxu1 %v1460_v28  ;;  %v290_v26 = vld [vmem:[#allocation4 + $0x78] sm:$0xff]  ;;  %v382_v29 = vld [vmem:[#allocation4 + $0x88] sm:$0xff] }
  0x50   :  { %1451 = vmatpush3.bf16.msra.mxu0 %v1448_v5  ;;  %1463 = vmatpush3.bf16.msra.mxu1 %v1460_v28  ;;  %v381_v28 = vld [vmem:[#allocation4 + $0x80] sm:$0xff] }
  0x51   :  { %1453 = vmatprep.subr.bf16.mxu0 %v1452_v9  ;;  %1465 = vmatprep.subr.bf16.mxu1 %v1464_v30 }
  0x54   :  { %1455 = vmatpush3.bf16.msra.mxu0 %v1452_v9  ;;  %1467 = vmatpush3.bf16.msra.mxu1 %v1464_v30  ;;  %v1468_v9 = vpack.c.bf16 %v280_v8, %v279_v7  ;;  %v383_v30 = vld [vmem:[#allocation4 + $0x90] sm:$0xff]  ;;  %v394_v7 = vld [vmem:[#allocation4 + $0xe8] sm:$0xff] }
  0x55   :  { %1457 = vmatprep.subr.bf16.mxu0 %v1456_v12 }
  0x56   :  { %1469 = vmatprep.subr.bf16.mxu1 %v1468_v9 }
  0x58   :  { %1459 = vmatpush3.bf16.msra.mxu0 %v1456_v12  ;;  %1471 = vmatpush3.bf16.msra.mxu1 %v1468_v9  ;;  %v1472_v12 = vpack.c.bf16 %v282_v11, %v281_v10  ;;  %v395_v9 = vld [vmem:[#allocation4 + $0xf0] sm:$0xff]  ;;  %v396_v10 = vld [vmem:[#allocation4 + $0xf8] sm:$0xff] }
  0x59   :  { %v1520_v11 = vpack.c.bf16 %v396_v10, %v395_v9  ;;  %v595_v10 = vld [vmem:[#allocation4 + $0x1d0] sm:$0xff] }
  0x5a   :  { %1473 = vmatprep.subr.bf16.mxu1 %v1472_v12 }
  0x5b   :  { %1237 = vmatmul.mubr.msk.f32.vlgmr.msra.gmra.mrb[0].mxu0 %vm119_vm0, %v73_v13  ;;  %v283_v13 = vld [vmem:[#allocation4 + $0x40] sm:$0xff] }
  0x5c   :  { %1475 = vmatpush3.bf16.msra.mxu1 %v1472_v12  ;;  %v487_v12 = vld [vmem:[#allocation4 + $0x100] sm:$0xff] }
 0x12e   :  { %v1238_v19 = vpop.f32.mrb[0].mxu0 }
 0x12f   :  { %v192_v20 = vpop.f32.mrb[1].mxu0  ;;  %v198_v22 = vadd.f32 %v1238_v19, %v118_v18  ;;  %v285_v19 = vld [vmem:[#allocation4 + $0x50] sm:$0xff] }
 0x130   :  { %v193_v21 = vadd.f32 %v192_v20, %v118_v18  ;;  %v1476_v18 = vpack.c.bf16 %v284_v14, %v283_v13  ;;  %v286_v20 = vld [vmem:[#allocation4 + $0x58] sm:$0xff]  ;;  %v488_v13 = vld [vmem:[#allocation4 + $0x108] sm:$0xff]  ;;  %v489_v14 = vld [vmem:[#allocation4 + $0x110] sm:$0xff] }
 0x131   :  { %v206_v24 = vmul.f32 %v198_v22, %v198_v22 }
 0x132   :  { %201 = vadd.xlane.f32.xlu0 %v193_v21  ;;  %v205_v23 = vmul.f32 %v193_v21, %v193_v21  ;;  %1477 = vmatprep.subr.bf16.mxu1 %v1476_v18 }
 0x133   :  { %1479 = vmatpush3.bf16.msra.mxu1 %v1476_v18  ;;  %v1524_v18 = vpack.c.bf16 %v488_v13, %v487_v12  ;;  %v597_v13 = vld [vmem:[#allocation4 + $0x1e0] sm:$0xff] }
 0x134   :  { %207 = vadd.xlane.f32.xlu1 %v205_v23  ;;  %v288_v23 = vld [vmem:[#allocation4 + $0x68] sm:$0xff] }
 0x136   :  { %203 = vadd.xlane.f32.xlu0 %v198_v22 }
 0x138   :  { %209 = vadd.xlane.f32.xlu1 %v206_v24  ;;  %v289_v24 = vld [vmem:[#allocation4 + $0x70] sm:$0xff] }
 0x139   :  { %v1488_v27 = vpack.c.bf16 %v290_v26, %v289_v24  ;;  %v293_v24 = vsub.s32 3, %v1899_v15 }
 0x1bf   :  { %v202_v31 = vpop.xlane.xlu0 %201 }
 0x1c0   :  { %v211_v32 = vmul.f32 0.0078125, %v202_v31  ;;  %v1492_v31 = vpack.c.bf16 %v382_v29, %v381_v28 }
 0x1c1   :  { %v208_v33 = vpop.xlane.xlu1 %207 }
 0x1c2   :  { %v215_v34 = vmul.f32 %v211_v32, %v211_v32  ;;  %v213_v35 = vmul.f32 0.0078125, %v208_v33  ;;  %v223_v47 = vsub.f32 %v193_v21, %v211_v32  ;;  %v1480_v21 = vpack.c.bf16 %v286_v20, %v285_v19  ;;  %v384_v32 = vld [vmem:[#allocation4 + $0x98] sm:$0xff]  ;;  %1493 = vmatprep.subr.bf16.mxu0 %v1492_v31 }
 0x1c3   :  { %v204_v36 = vpop.xlane.xlu0 %203  ;;  %v1496_v33 = vpack.c.bf16 %v384_v32, %v383_v30  ;;  %1495 = vmatpush3.bf16.msra.mxu0 %v1492_v31  ;;  %v490_v19 = vld [vmem:[#allocation4 + $0x118] sm:$0xff] }
 0x1c4   :  { %v217_v37 = vsub.f32 %v213_v35, %v215_v34  ;;  %v212_v38 = vmul.f32 0.0078125, %v204_v36  ;;  %1481 = vmatprep.subr.bf16.mxu1 %v1480_v21  ;;  %v385_v34 = vld [vmem:[#allocation4 + $0xa0] sm:$0xff]  ;;  %v386_v35 = vld [vmem:[#allocation4 + $0xa8] sm:$0xff]  ;;  %v1528_v20 = vpack.c.bf16 %v490_v19, %v489_v14  ;;  %v399_v19 = vsub.s32 4, %v1899_v15 }
 0x1c5   :  { %v210_v39 = vpop.xlane.xlu1 %209  ;;  %1483 = vmatpush3.bf16.msra.mxu1 %v1480_v21  ;;  %1497 = vmatprep.subr.bf16.mxu0 %v1496_v33  ;;  %v1500_v36 = vpack.c.bf16 %v386_v35, %v385_v34  ;;  %v491_v21 = vld [vmem:[#allocation4 + $0x120] sm:$0xff]  ;;  %v598_v14 = vld [vmem:[#allocation4 + $0x1e8] sm:$0xff] }
 0x1c6   :  { %v219_v40 = vadd.f32 1e-05, %v217_v37  ;;  %v216_v41 = vmul.f32 %v212_v38, %v212_v38  ;;  %v214_v42 = vmul.f32 0.0078125, %v210_v39  ;;  %v224_v52 = vsub.f32 %v198_v22, %v212_v38  ;;  %v287_v22 = vld [vmem:[#allocation4 + $0x60] sm:$0xff] }
 0x1c7   :  { %v1484_v25 = vpack.c.bf16 %v288_v23, %v287_v22  ;;  %1499 = vmatpush3.bf16.msra.mxu0 %v1496_v33  ;;  %v492_v22 = vld [vmem:[#allocation4 + $0x128] sm:$0xff] }
 0x1c8   :  { %1650 = vrsqrt.f32 %v219_v40  ;;  %v218_v43 = vsub.f32 %v214_v42, %v216_v41  ;;  %1501 = vmatprep.subr.bf16.mxu0 %v1500_v36  ;;  %v1532_v23 = vpack.c.bf16 %v492_v22, %v491_v21 }
 0x1c9   :  { %1485 = vmatprep.subr.bf16.mxu1 %v1484_v25 }
 0x1ca   :  { %v220_v44 = vadd.f32 1e-05, %v218_v43  ;;  %1487 = vmatpush3.bf16.msra.mxu1 %v1484_v25  ;;  %v294_v25 = vrot.slane %v1902_v17, %v293_v24 }
 0x1cb   :  { %1489 = vmatprep.subr.bf16.mxu1 %v1488_v27  ;;  %1503 = vmatpush3.bf16.msra.mxu0 %v1500_v36 }
 0x1cc   :  { %1652 = vrsqrt.f32 %v220_v44 }
 0x1ce   :  { %1491 = vmatpush3.bf16.msra.mxu1 %v1488_v27 }
 0x1cf   :  { %1525 = vmatprep.subr.bf16.mxu1 %v1524_v18 }
 0x1d2   :  { %v1651_v49 = vpop.eup %1650 }
 0x1d3   :  { %v225_v50 = vmul.f32 %v1651_v49, %v223_v47 }
 0x1d5   :  { %v231_v53 = vmul.f32 %v230_v48, %v225_v50 }
 0x1d6   :  { %v1653_v54 = vpop.eup %1652 }
 0x1d7   :  { %v226_v55 = vmul.f32 %v1653_v54, %v224_v52  ;;  %v237_v56 = vadd.f32 %v236_v51, %v231_v53 }
 0x1d9   :  { %v241_v57 = vmul.f32 0.70710677, %v237_v56  ;;  %v232_v58 = vmul.f32 %v230_v48, %v226_v55  ;;  %v239_v62 = vmul.f32 0.5, %v237_v56 }
 0x1db   :  { %1654 = verf.f32 %v241_v57  ;;  %v238_v59 = vadd.f32 %v236_v51, %v232_v58 }
 0x1dd   :  { %v242_v60 = vmul.f32 0.70710677, %v238_v59  ;;  %v240_v2 = vmul.f32 0.5, %v238_v59  ;;  %v387_v59 = vld [vmem:[#allocation4 + $0xb0] sm:$0xff] }
 0x1df   :  { %1656 = verf.f32 %v242_v60  ;;  %v388_v60 = vld [vmem:[#allocation4 + $0xb8] sm:$0xff] }
 0x1e5   :  { %v1655_v61 = vpop.eup %1654 }
 0x1e6   :  { %v245_v63 = vadd.f32 1.0, %v1655_v61  ;;  %v1504_v61 = vpack.c.bf16 %v388_v60, %v387_v59  ;;  %v587_v59 = vld [vmem:[#allocation4 + $0x190] sm:$0xff] }
 0x1e8   :  { %v1915_v0 = vmul.f32 %v245_v63, %v239_v62  ;;  %1505 = vmatprep.subr.bf16.mxu0 %v1504_v61  ;;  %v389_v62 = vld [vmem:[#allocation4 + $0xc0] sm:$0xff]  ;;  %v390_v63 = vld [vmem:[#allocation4 + $0xc8] sm:$0xff] }
 0x1e9   :  { %v1657_v1 = vpop.eup %1656  ;;  %1507 = vmatpush3.bf16.msra.mxu0 %v1504_v61  ;;  %v588_v61 = vld [vmem:[#allocation4 + $0x198] sm:$0xff] }
 0x1ea   :  { %249 = vadd.xlane.f32.xlu0 %v1915_v0  ;;  %v246_v3 = vadd.f32 1.0, %v1657_v1  ;;  %v253_v4 = vmul.f32 %v1915_v0, %v1915_v0  ;;  %v1508_v1 = vpack.c.bf16 %v390_v63, %v389_v62  ;;  %v1560_v62 = vpack.c.bf16 %v588_v61, %v587_v59  ;;  %v589_v63 = vld [vmem:[#allocation4 + $0x1a0] sm:$0xff]  ;;  %v88_v59 = vld [vmem:[#allocation6 + $0x98] sm:$0xff] }
 0x1eb   :  { %v89_v61 = vld [vmem:[#allocation6 + $0xa0] sm:$0xff] }
 0x1ec   :  { %v1920_v5 = vmul.f32 %v246_v3, %v240_v2  ;;  %1509 = vmatprep.subr.bf16.mxu0 %v1508_v1  ;;  %v391_v2 = vld [vmem:[#allocation4 + $0xd0] sm:$0xff]  ;;  %v392_v3 = vld [vmem:[#allocation4 + $0xd8] sm:$0xff] }
 0x1ed   :  { %1511 = vmatpush3.bf16.msra.mxu0 %v1508_v1  ;;  %v590_v1 = vld [vmem:[#allocation4 + $0x1a8] sm:$0xff] }
 0x1ee   :  { %255 = vadd.xlane.f32.xlu0 %v253_v4  ;;  %251 = vadd.xlane.f32.xlu1 %v1920_v5  ;;  %v254_v6 = vmul.f32 %v1920_v5, %v1920_v5  ;;  %v1512_v4 = vpack.c.bf16 %v392_v3, %v391_v2  ;;  %v1564_v2 = vpack.c.bf16 %v590_v1, %v589_v63  ;;  %v591_v3 = vld [vmem:[#allocation4 + $0x1b0] sm:$0xff] }
 0x1ef   :  { %v91_v1 = vld [vmem:[#allocation6 + $0xb0] sm:$0xff] }
 0x1f0   :  { %1513 = vmatprep.subr.bf16.mxu0 %v1512_v4 }
 0x1f1   :  { %1515 = vmatpush3.bf16.msra.mxu0 %v1512_v4  ;;  %v592_v4 = vld [vmem:[#allocation4 + $0x1b8] sm:$0xff] }
 0x1f2   :  { %257 = vadd.xlane.f32.xlu1 %v254_v6  ;;  %v393_v6 = vld [vmem:[#allocation4 + $0xe0] sm:$0xff] }
 0x1f3   :  { %v1516_v8 = vpack.c.bf16 %v394_v7, %v393_v6  ;;  %v1568_v6 = vpack.c.bf16 %v592_v4, %v591_v3  ;;  %v593_v7 = vld [vmem:[#allocation4 + $0x1c0] sm:$0xff] }
 0x1f4   :  { %v93_v3 = vld [vmem:[#allocation6 + $0xc0] sm:$0xff] }
 0x1f5   :  { %1517 = vmatprep.subr.bf16.mxu0 %v1516_v8 }
 0x1f6   :  { %1519 = vmatpush3.bf16.msra.mxu0 %v1516_v8  ;;  %v594_v8 = vld [vmem:[#allocation4 + $0x1c8] sm:$0xff] }
 0x1f7   :  { %1521 = vmatprep.subr.bf16.mxu0 %v1520_v11  ;;  %v1572_v9 = vpack.c.bf16 %v594_v8, %v593_v7  ;;  %v95_v8 = vld [vmem:[#allocation6 + $0xd0] sm:$0xff] }
 0x1fa   :  { %1523 = vmatpush3.bf16.msra.mxu0 %v1520_v11  ;;  %v596_v11 = vld [vmem:[#allocation4 + $0x1d8] sm:$0xff] }
 0x1fb   :  { %v1576_v12 = vpack.c.bf16 %v596_v11, %v595_v10  ;;  %v97_v11 = vld [vmem:[#allocation6 + $0xe0] sm:$0xff] }
 0x277   :  { %v250_v37 = vpop.xlane.xlu0 %249 }
 0x278   :  { %v259_v38 = vmul.f32 0.0078125, %v250_v37 }
 0x27a   :  { %v263_v41 = vmul.f32 %v259_v38, %v259_v38  ;;  %v271_v53 = vsub.f32 %v1915_v0, %v259_v38 }
 0x27b   :  { %v256_v39 = vpop.xlane.xlu0 %255  ;;  %v252_v40 = vpop.xlane.xlu1 %251 }
 0x27c   :  { %v261_v42 = vmul.f32 0.0078125, %v256_v39  ;;  %v260_v43 = vmul.f32 0.0078125, %v252_v40  ;;  %v493_v40 = vld [vmem:[#allocation4 + $0x130] sm:$0xff] }
 0x27e   :  { %v265_v44 = vsub.f32 %v261_v42, %v263_v41  ;;  %v264_v49 = vmul.f32 %v260_v43, %v260_v43  ;;  %v272_v56 = vsub.f32 %v1920_v5, %v260_v43  ;;  %v494_v41 = vld [vmem:[#allocation4 + $0x138] sm:$0xff]  ;;  %v495_v43 = vld [vmem:[#allocation4 + $0x140] sm:$0xff] }
 0x27f   :  { %v258_v47 = vpop.xlane.xlu1 %257  ;;  %v1536_v42 = vpack.c.bf16 %v494_v41, %v493_v40 }
 0x280   :  { %v267_v48 = vadd.f32 1e-05, %v265_v44  ;;  %v262_v50 = vmul.f32 0.0078125, %v258_v47  ;;  %v496_v44 = vld [vmem:[#allocation4 + $0x148] sm:$0xff] }
 0x281   :  { %v1540_v47 = vpack.c.bf16 %v496_v44, %v495_v43 }
 0x282   :  { %1658 = vrsqrt.f32 %v267_v48  ;;  %v266_v51 = vsub.f32 %v262_v50, %v264_v49  ;;  %v497_v48 = vld [vmem:[#allocation4 + $0x150] sm:$0xff]  ;;  %v498_v49 = vld [vmem:[#allocation4 + $0x158] sm:$0xff] }
 0x283   :  { %v1544_v50 = vpack.c.bf16 %v498_v49, %v497_v48  ;;  %v603_v49 = vsub.s32 6, %v1899_v15 }
 0x284   :  { %v268_v52 = vadd.f32 1e-05, %v266_v51  ;;  %v499_v51 = vld [vmem:[#allocation4 + $0x160] sm:$0xff] }
 0x286   :  { %1660 = vrsqrt.f32 %v268_v52  ;;  %v500_v52 = vld [vmem:[#allocation4 + $0x168] sm:$0xff] }
 0x28c   :  { %v1659_v54 = vpop.eup %1658 }
 0x28d   :  { %v273_v55 = vmul.f32 %v1659_v54, %v271_v53  ;;  %v1548_v53 = vpack.c.bf16 %v500_v52, %v499_v51  ;;  %v501_v54 = vld [vmem:[#allocation4 + $0x170] sm:$0xff] }
 0x28f   :  { %1271 = vmatprep.mubr.f32.mxu1 %v273_v55  ;;  %v502_v55 = vld [vmem:[#allocation4 + $0x178] sm:$0xff] }
 0x290   :  { %v1661_v57 = vpop.eup %1660 }
 0x291   :  { %v274_v58 = vmul.f32 %v1661_v57, %v272_v56  ;;  %v1552_v56 = vpack.c.bf16 %v502_v55, %v501_v54  ;;  %v585_v57 = vld [vmem:[#allocation4 + $0x180] sm:$0xff] }
 0x292   :  { %v85_v55 = vld [vmem:[#allocation6 + $0x80] sm:$0xff] }
 0x293   :  { %1272 = vmatmul.mubr.f32.vlgmr.msra.gmra.mrb[0].mxu1 %v274_v58  ;;  %v586_v58 = vld [vmem:[#allocation4 + $0x188] sm:$0xff] }
 0x294   :  { %1527 = vmatpush3.bf16.msra.mxu1 %v1524_v18  ;;  %v1556_v60 = vpack.c.bf16 %v586_v58, %v585_v57  ;;  %v1580_v18 = vpack.c.bf16 %v598_v14, %v597_v13  ;;  %v87_v58 = vld [vmem:[#allocation6 + $0x90] sm:$0xff] }
 0x295   :  { %1529 = vmatprep.subr.bf16.mxu1 %v1528_v20  ;;  %v99_v14 = vld [vmem:[#allocation6 + $0xf0] sm:$0xff] }
 0x296   :  { %1557 = vmatprep.subr.bf16.mxu0 %v1556_v60 }
 0x298   :  { %1531 = vmatpush3.bf16.msra.mxu1 %v1528_v20  ;;  %v400_v20 = vrot.slane %v1902_v17, %v399_v19 }
 0x299   :  { %1533 = vmatprep.subr.bf16.mxu1 %v1532_v23 }
 0x29c   :  { %1535 = vmatpush3.bf16.msra.mxu1 %v1532_v23 }
 0x29d   :  { %1537 = vmatprep.subr.bf16.mxu1 %v1536_v42 }
 0x2a0   :  { %1539 = vmatpush3.bf16.msra.mxu1 %v1536_v42 }
 0x2a1   :  { %1541 = vmatprep.subr.bf16.mxu1 %v1540_v47 }
 0x2a4   :  { %1543 = vmatpush3.bf16.msra.mxu1 %v1540_v47 }
 0x2a5   :  { %1545 = vmatprep.subr.bf16.mxu1 %v1544_v50 }
 0x2a8   :  { %1547 = vmatpush3.bf16.msra.mxu1 %v1544_v50  ;;  %v604_v50 = vrot.slane %v1902_v17, %v603_v49 }
 0x2a9   :  { %1549 = vmatprep.subr.bf16.mxu1 %v1548_v53 }
 0x2ac   :  { %1551 = vmatpush3.bf16.msra.mxu1 %v1548_v53 }
 0x2ad   :  { %1553 = vmatprep.subr.bf16.mxu1 %v1552_v56 }
 0x2b0   :  { %1555 = vmatpush3.bf16.msra.mxu1 %v1552_v56  ;;  %v86_v56 = vld [vmem:[#allocation6 + $0x88] sm:$0xff] }
 0x2b1   :  { %v1588_v57 = vpack.c.bf16 %v86_v56, %v85_v55 }
 0x2b3   :  { %1589 = vmatprep.subr.bf16.mxu1 %v1588_v57 }
 0x366   :  { %v1273_v26 = vpop.f32.mrb[0].mxu1 }
 0x367   :  { %v367_v27 = vadd.f32 %v1273_v26, %v294_v25  ;;  %v361_v28 = vpop.f32.mrb[1].mxu1 }
 0x368   :  { %v362_v29 = vadd.f32 %v361_v28, %v294_v25 }
 0x369   :  { %v373_v30 = vmul.f32 0.70710677, %v367_v27  ;;  %v371_v37 = vmul.f32 0.5, %v367_v27 }
 0x36a   :  { %v372_v31 = vmul.f32 0.70710677, %v362_v29  ;;  %v370_v35 = vmul.f32 0.5, %v362_v29 }
 0x36b   :  { %1662 = verf.f32 %v373_v30 }
 0x36c   :  { %1664 = verf.f32 %v372_v31 }
 0x375   :  { %v1663_v32 = vpop.eup %1662 }
 0x376   :  { %v1665_v33 = vpop.eup %1664  ;;  %v377_v34 = vadd.f32 1.0, %v1663_v32 }
 0x377   :  { %v376_v36 = vadd.f32 1.0, %v1665_v33 }
 0x378   :  { %v379_v39 = vmul.f32 %v377_v34, %v371_v37  ;;  %v600_v37 = vld [vmem:[#allocation4 + $0x1f8] sm:$0xff] }
 0x379   :  { %v378_v38 = vmul.f32 %v376_v36, %v370_v35  ;;  %v599_v36 = vld [vmem:[#allocation4 + $0x1f0] sm:$0xff] }
 0x37b   :  { %1306 = vmatprep.mubr.f32.mxu0 %v378_v38  ;;  %v1584_v38 = vpack.c.bf16 %v600_v37, %v599_v36  ;;  %v708_v36 = vsub.s32 7, %v1899_v15  ;;  %v1956_v37 = vld [vmem:[#allocation7 + $0x8] sm:$0xff] }
 0x37c   :  { %1307 = vmatmul.mubr.f32.vlgmr.msra.gmra.mrb[2].mxu0 %v379_v39  ;;  %v505_v39 = vsub.s32 5, %v1899_v15 }
 0x37d   :  { %1559 = vmatpush3.bf16.msra.mxu0 %v1556_v60  ;;  %v1592_v60 = vpack.c.bf16 %v88_v59, %v87_v58 }
 0x37e   :  { %1561 = vmatprep.subr.bf16.mxu0 %v1560_v62  ;;  %v506_v40 = vrot.slane %v1902_v17, %v505_v39 }
 0x381   :  { %1563 = vmatpush3.bf16.msra.mxu0 %v1560_v62  ;;  %v90_v62 = vld [vmem:[#allocation6 + $0xa8] sm:$0xff] }
 0x382   :  { %1565 = vmatprep.subr.bf16.mxu0 %v1564_v2  ;;  %v1596_v63 = vpack.c.bf16 %v90_v62, %v89_v61 }
 0x385   :  { %1567 = vmatpush3.bf16.msra.mxu0 %v1564_v2  ;;  %v92_v2 = vld [vmem:[#allocation6 + $0xb8] sm:$0xff] }
 0x386   :  { %1569 = vmatprep.subr.bf16.mxu0 %v1568_v6  ;;  %v1600_v4 = vpack.c.bf16 %v92_v2, %v91_v1 }
 0x389   :  { %1571 = vmatpush3.bf16.msra.mxu0 %v1568_v6  ;;  %v94_v6 = vld [vmem:[#allocation6 + $0xc8] sm:$0xff] }
 0x38a   :  { %1573 = vmatprep.subr.bf16.mxu0 %v1572_v9  ;;  %v1604_v7 = vpack.c.bf16 %v94_v6, %v93_v3 }
 0x38d   :  { %1575 = vmatpush3.bf16.msra.mxu0 %v1572_v9  ;;  %v96_v9 = vld [vmem:[#allocation6 + $0xd8] sm:$0xff] }
 0x38e   :  { %1577 = vmatprep.subr.bf16.mxu0 %v1576_v12  ;;  %v1608_v10 = vpack.c.bf16 %v96_v9, %v95_v8  ;;  %v102_v9 = vld [vmem:[#allocation6 + $0x100] sm:$0xff] }
 0x391   :  { %1579 = vmatpush3.bf16.msra.mxu0 %v1576_v12  ;;  %v98_v12 = vld [vmem:[#allocation6 + $0xe8] sm:$0xff] }
 0x392   :  { %1581 = vmatprep.subr.bf16.mxu0 %v1580_v18  ;;  %v1612_v13 = vpack.c.bf16 %v98_v12, %v97_v11  ;;  %v105_v12 = vld [vmem:[#allocation6 + $0x118] sm:$0xff] }
 0x395   :  { %1583 = vmatpush3.bf16.msra.mxu0 %v1580_v18  ;;  %v100_v18 = vld [vmem:[#allocation6 + $0xf8] sm:$0xff] }
 0x396   :  { %1585 = vmatprep.subr.bf16.mxu0 %v1584_v38 }
 0x399   :  { %1587 = vmatpush3.bf16.msra.mxu0 %v1584_v38 }
 0x44f   :  { %v1308_v21 = vpop.f32.mrb[2].mxu0 }
 0x450   :  { %v473_v22 = vadd.f32 %v1308_v21, %v400_v20  ;;  %v467_v23 = vpop.f32.mrb[3].mxu0 }
 0x451   :  { %v468_v25 = vadd.f32 %v467_v23, %v400_v20  ;;  %v1616_v20 = vpack.c.bf16 %v100_v18, %v99_v14  ;;  %v106_v14 = vld [vmem:[#allocation6 + $0x120] sm:$0xff]  ;;  %v107_v18 = vld [vmem:[#allocation6 + $0x128] sm:$0xff] }
 0x452   :  { %v479_v26 = vmul.f32 0.70710677, %v473_v22  ;;  %v477_v33 = vmul.f32 0.5, %v473_v22 }
 0x453   :  { %v478_v27 = vmul.f32 0.70710677, %v468_v25  ;;  %v476_v31 = vmul.f32 0.5, %v468_v25 }
 0x454   :  { %1666 = verf.f32 %v479_v26 }
 0x455   :  { %1668 = verf.f32 %v478_v27 }
 0x45e   :  { %v1667_v28 = vpop.eup %1666 }
 0x45f   :  { %v1669_v29 = vpop.eup %1668  ;;  %v483_v30 = vadd.f32 1.0, %v1667_v28 }
 0x460   :  { %v482_v32 = vadd.f32 1.0, %v1669_v29 }
 0x461   :  { %v485_v35 = vmul.f32 %v483_v30, %v477_v33 }
 0x462   :  { %v484_v34 = vmul.f32 %v482_v32, %v476_v31 }
 0x464   :  { %1341 = vmatprep.mubr.f32.mxu1 %v484_v34 }
 0x465   :  { %1342 = vmatmul.mubr.f32.vlgmr.msra.gmra.mrb[2].mxu1 %v485_v35 }
 0x466   :  { %1591 = vmatpush3.bf16.msra.mxu1 %v1588_v57 }
 0x467   :  { %1593 = vmatprep.subr.bf16.mxu1 %v1592_v60 }
 0x46a   :  { %1595 = vmatpush3.bf16.msra.mxu1 %v1592_v60 }
 0x46b   :  { %1597 = vmatprep.subr.bf16.mxu1 %v1596_v63 }
 0x46e   :  { %1599 = vmatpush3.bf16.msra.mxu1 %v1596_v63 }
 0x46f   :  { %1601 = vmatprep.subr.bf16.mxu1 %v1600_v4 }
 0x472   :  { %1603 = vmatpush3.bf16.msra.mxu1 %v1600_v4 }
 0x473   :  { %1605 = vmatprep.subr.bf16.mxu1 %v1604_v7 }
 0x476   :  { %1607 = vmatpush3.bf16.msra.mxu1 %v1604_v7 }
 0x477   :  { %1609 = vmatprep.subr.bf16.mxu1 %v1608_v10 }
 0x47a   :  { %1611 = vmatpush3.bf16.msra.mxu1 %v1608_v10  ;;  %v104_v10 = vld [vmem:[#allocation6 + $0x110] sm:$0xff] }
 0x47b   :  { %1613 = vmatprep.subr.bf16.mxu1 %v1612_v13 }
 0x47e   :  { %1615 = vmatpush3.bf16.msra.mxu1 %v1612_v13  ;;  %v1624_v13 = vpack.c.bf16 %v105_v12, %v104_v10  ;;  %v113_v10 = vld [vmem:[#allocation6 + $0x190] sm:$0xff]  ;;  %v114_v12 = vld [vmem:[#allocation6 + $0x198] sm:$0xff] }
 0x47f   :  { %1617 = vmatprep.subr.bf16.mxu1 %v1616_v20 }
 0x482   :  { %1619 = vmatpush3.bf16.msra.mxu1 %v1616_v20  ;;  %v1628_v20 = vpack.c.bf16 %v107_v18, %v106_v14 }
 0x538   :  { %v1343_v41 = vpop.f32.mrb[2].mxu1 }
 0x539   :  { %v579_v42 = vadd.f32 %v1343_v41, %v506_v40  ;;  %v573_v43 = vpop.f32.mrb[3].mxu1 }
 0x53a   :  { %v574_v44 = vadd.f32 %v573_v43, %v506_v40  ;;  %v709_v40 = vrot.slane %v1902_v17, %v708_v36 }
 0x53b   :  { %v583_v48 = vadd.f32 %v579_v42, %v1920_v5 }
 0x53c   :  { %v582_v47 = vadd.f32 %v574_v44, %v1915_v0  ;;  %v715_v44 = vrot.slane %v1956_v37, %v117_v16  ;;  %v731_v16 = vrot.slane %v1956_v37, %v229_v45  ;;  %v103_v45 = vld [vmem:[#allocation6 + $0x108] sm:$0xff] }
 0x53d   :  { %v1620_v11 = vpack.c.bf16 %v103_v45, %v102_v9  ;;  %v112_v45 = vld [vmem:[#allocation6 + $0x188] sm:$0xff] }
 0x53e   :  { %1376 = vmatprep.mubr.f32.mxu0 %v582_v47 }
 0x53f   :  { %1377 = vmatmul.mubr.f32.vlgmr.msra.gmra.mrb[4].mxu0 %v583_v48  ;;  %1621 = vmatprep.subr.bf16.mxu0 %v1620_v11 }
 0x540   :  { %1623 = vmatpush3.bf16.msra.mxu0 %v1620_v11 }
 0x541   :  { %1625 = vmatprep.subr.bf16.mxu0 %v1624_v13 }
 0x544   :  { %1627 = vmatpush3.bf16.msra.mxu0 %v1624_v13  ;;  %v1640_v13 = vpack.c.bf16 %v114_v12, %v113_v10 }
 0x545   :  { %1629 = vmatprep.subr.bf16.mxu0 %v1628_v20 }
 0x548   :  { %1631 = vmatpush3.bf16.msra.mxu0 %v1628_v20 }
 0x612   :  { %v1378_v51 = vpop.f32.mrb[4].mxu0 }
 0x613   :  { %v1945_v52 = vadd.f32 %v1378_v51, %v604_v50  ;;  %v671_v53 = vpop.f32.mrb[5].mxu0 }
 0x614   :  { %v1947_v54 = vadd.f32 %v671_v53, %v604_v50 }
 0x615   :  { %682 = vadd.xlane.f32.xlu1 %v1945_v52  ;;  %v685_v0 = vmul.f32 %v1945_v52, %v1945_v52 }
 0x616   :  { %680 = vadd.xlane.f32.xlu0 %v1947_v54  ;;  %v684_v5 = vmul.f32 %v1947_v54, %v1947_v54 }
 0x619   :  { %688 = vadd.xlane.f32.xlu1 %v685_v0 }
 0x61a   :  { %686 = vadd.xlane.f32.xlu0 %v684_v5 }
 0x6a2   :  { %v683_v21 = vpop.xlane.xlu1 %682 }
 0x6a3   :  { %v691_v22 = vmul.f32 0.0078125, %v683_v21  ;;  %v681_v23 = vpop.xlane.xlu0 %680  ;;  %v108_v21 = vld [vmem:[#allocation6 + $0x130] sm:$0xff] }
 0x6a4   :  { %v690_v25 = vmul.f32 0.0078125, %v681_v23 }
 0x6a5   :  { %v695_v27 = vmul.f32 %v691_v22, %v691_v22  ;;  %v703_v38 = vsub.f32 %v1945_v52, %v691_v22  ;;  %v109_v22 = vld [vmem:[#allocation6 + $0x138] sm:$0xff] }
 0x6a6   :  { %v689_v26 = vpop.xlane.xlu1 %688  ;;  %v694_v30 = vmul.f32 %v690_v25, %v690_v25  ;;  %v702_v42 = vsub.f32 %v1947_v54, %v690_v25  ;;  %v1632_v23 = vpack.c.bf16 %v109_v22, %v108_v21 }
 0x6a7   :  { %v693_v28 = vmul.f32 0.0078125, %v689_v26  ;;  %v687_v29 = vpop.xlane.xlu0 %686 }
 0x6a8   :  { %v692_v31 = vmul.f32 0.0078125, %v687_v29  ;;  %1633 = vmatprep.subr.bf16.mxu0 %v1632_v23 }
 0x6a9   :  { %v697_v32 = vsub.f32 %v693_v28, %v695_v27  ;;  %1635 = vmatpush3.bf16.msra.mxu0 %v1632_v23 }
 0x6aa   :  { %v696_v33 = vsub.f32 %v692_v31, %v694_v30 }
 0x6ab   :  { %v699_v34 = vadd.f32 1e-05, %v697_v32 }
 0x6ac   :  { %v698_v35 = vadd.f32 1e-05, %v696_v33 }
 0x6ad   :  { %1670 = vrsqrt.f32 %v699_v34 }
 0x6ae   :  { %1672 = vrsqrt.f32 %v698_v35 }
 0x6b7   :  { %v1671_v41 = vpop.eup %1670 }
 0x6b8   :  { %v1673_v43 = vpop.eup %1672  ;;  %v705_v47 = vmul.f32 %v1671_v41, %v703_v38 }
 0x6b9   :  { %v704_v48 = vmul.f32 %v1673_v43, %v702_v42  ;;  %v840_v43 = vrot.slane %v1956_v37, %v235_v46 }
 0x6ba   :  { %v711_v50 = vmul.f32 %v709_v40, %v705_v47 }
 0x6bb   :  { %v710_v51 = vmul.f32 %v709_v40, %v704_v48 }
 0x6bc   :  { %v717_v53 = vadd.f32 %v715_v44, %v711_v50  ;;  %v846_v50 = vrot.slane %v1956_v37, %v293_v24  ;;  %v862_v24 = vrot.slane %v1956_v37, %v399_v19  ;;  %v111_v19 = vld [vmem:[#allocation6 + $0x180] sm:$0xff] }
 0x6bd   :  { %v716_v0 = vadd.f32 %v715_v44, %v710_v51  ;;  %v1636_v11 = vpack.c.bf16 %v112_v45, %v111_v19 }
 0x6be   :  { %v721_v5 = vmul.f32 0.70710677, %v717_v53  ;;  %v719_v58 = vmul.f32 0.5, %v717_v53 }
 0x6bf   :  { %v720_v52 = vmul.f32 0.70710677, %v716_v0  ;;  %v718_v57 = vmul.f32 0.5, %v716_v0  ;;  %1637 = vmatprep.subr.bf16.mxu0 %v1636_v11 }
 0x6c0   :  { %1674 = verf.f32 %v721_v5 }
 0x6c1   :  { %1676 = verf.f32 %v720_v52 }
 0x6ca   :  { %v1675_v55 = vpop.eup %1674 }
 0x6cb   :  { %v1677_v17 = vpop.eup %1676  ;;  %v725_v56 = vadd.f32 1.0, %v1675_v55 }
 0x6cc   :  { %v724_v54 = vadd.f32 1.0, %v1677_v17 }
 0x6cd   :  { %v727_v60 = vmul.f32 %v725_v56, %v719_v58 }
 0x6ce   :  { %v726_v59 = vmul.f32 %v724_v54, %v718_v57 }
 0x6d0   :  { %1411 = vmatprep.mubr.f32.mxu1 %v726_v59 }
 0x6d1   :  { %1412 = vmatmul.mubr.f32.vlgmr.msra.gmra.mrb[4].mxu1 %v727_v60 }
 0x7a4   :  { %v1413_v61 = vpop.f32.mrb[4].mxu1 }
 0x7a5   :  { %v804_v62 = vadd.f32 %v1413_v61, %v731_v16  ;;  %v798_v63 = vpop.f32.mrb[5].mxu1 }
 0x7a6   :  { %v799_v1 = vadd.f32 %v798_v63, %v731_v16 }
 0x7a7   :  { %v810_v2 = vsel %vm119_vm0, %v804_v62, 0.0  ;;  %v814_v3 = vmul.f32 %v804_v62, %v804_v62 }
 0x7a8   :  { %811 = vadd.xlane.f32.xlu1 %v810_v2  ;;  %v807_v4 = vsel %vm119_vm0, %v799_v1, 0.0  ;;  %v813_v6 = vmul.f32 %v799_v1, %v799_v1 }
 0x7a9   :  { %808 = vadd.xlane.f32.xlu0 %v807_v4  ;;  %v818_v7 = vsel %vm119_vm0, %v814_v3, 0.0 }
 0x7aa   :  { %v815_v8 = vsel %vm119_vm0, %v813_v6, 0.0 }
 0x7ac   :  { %819 = vadd.xlane.f32.xlu1 %v818_v7 }
 0x7ad   :  { %816 = vadd.xlane.f32.xlu0 %v815_v8 }
 0x835   :  { %v812_v25 = vpop.xlane.xlu1 %811 }
 0x836   :  { %v822_v26 = vmul.f32 0.015625, %v812_v25  ;;  %v809_v27 = vpop.xlane.xlu0 %808 }
 0x837   :  { %v821_v28 = vmul.f32 0.015625, %v809_v27 }
 0x838   :  { %v826_v30 = vmul.f32 %v822_v26, %v822_v26  ;;  %v834_v42 = vsub.f32 %v804_v62, %v822_v26 }
 0x839   :  { %v820_v29 = vpop.xlane.xlu1 %819  ;;  %v825_v33 = vmul.f32 %v821_v28, %v821_v28  ;;  %v833_v47 = vsub.f32 %v799_v1, %v821_v28 }
 0x83a   :  { %v824_v31 = vmul.f32 0.015625, %v820_v29  ;;  %v817_v32 = vpop.xlane.xlu0 %816 }
 0x83b   :  { %v823_v34 = vmul.f32 0.015625, %v817_v32 }
 0x83c   :  { %v828_v35 = vsub.f32 %v824_v31, %v826_v30 }
 0x83d   :  { %v827_v38 = vsub.f32 %v823_v34, %v825_v33  ;;  %v978_v33 = vrot.slane %v1956_v37, %v505_v39 }
 0x83e   :  { %v830_v40 = vadd.f32 1e-05, %v828_v35 }
 0x83f   :  { %v829_v41 = vadd.f32 1e-05, %v827_v38 }
 0x840   :  { %1678 = vrsqrt.f32 %v830_v40 }
 0x841   :  { %1680 = vrsqrt.f32 %v829_v41  ;;  %v984_v41 = vrot.slane %v1956_v37, %v603_v49  ;;  %v1000_v49 = vrot.slane %v1956_v37, %v708_v36 }
 0x84a   :  { %v1679_v44 = vpop.eup %1678 }
 0x84b   :  { %v1681_v48 = vpop.eup %1680  ;;  %v836_v51 = vmul.f32 %v1679_v44, %v834_v42 }
 0x84c   :  { %v835_v53 = vmul.f32 %v1681_v48, %v833_v47 }
 0x84d   :  { %v842_v0 = vmul.f32 %v840_v43, %v836_v51 }
 0x84e   :  { %v841_v5 = vmul.f32 %v840_v43, %v835_v53 }
 0x84f   :  { %v848_v52 = vadd.f32 %v846_v50, %v842_v0 }
 0x850   :  { %v847_v55 = vadd.f32 %v846_v50, %v841_v5 }
 0x851   :  { %v852_v17 = vmul.f32 0.70710677, %v848_v52  ;;  %v850_v60 = vmul.f32 0.5, %v848_v52 }
 0x852   :  { %v851_v56 = vmul.f32 0.70710677, %v847_v55  ;;  %v849_v58 = vmul.f32 0.5, %v847_v55 }
 0x853   :  { %1682 = verf.f32 %v852_v17 }
 0x854   :  { %1684 = verf.f32 %v851_v56 }
 0x85d   :  { %v1683_v57 = vpop.eup %1682 }
 0x85e   :  { %v1685_v54 = vpop.eup %1684  ;;  %v856_v46 = vadd.f32 1.0, %v1683_v57 }
 0x85f   :  { %v855_v59 = vadd.f32 1.0, %v1685_v54 }
 0x860   :  { %v858_v61 = vmul.f32 %v856_v46, %v850_v60 }
 0x861   :  { %v857_v16 = vmul.f32 %v855_v59, %v849_v58 }
 0x863   :  { %1430 = vmatprep.mubr.msk.f32.mxu0 %vm119_vm0, %v857_v16 }
 0x864   :  { %1431 = vmatmul.mubr.msk.f32.vlgmr.msra.gmra.mrb[6].mxu0 %vm119_vm0, %v858_v61 }
 0x865   :  { %1639 = vmatpush3.bf16.msra.mxu0 %v1636_v11 }
 0x866   :  { %1641 = vmatprep.subr.bf16.mxu0 %v1640_v13 }
 0x869   :  { %1643 = vmatpush3.bf16.msra.mxu0 %v1640_v13 }
 0x937   :  { %v1432_v62 = vpop.f32.mrb[6].mxu0 }
 0x938   :  { %v941_v63 = vadd.f32 %v1432_v62, %v862_v24  ;;  %v935_v1 = vpop.f32.mrb[7].mxu0 }
 0x939   :  { %v936_v2 = vadd.f32 %v935_v1, %v862_v24 }
 0x93a   :  { %v948_v3 = vsel %vm944_vm1, %v941_v63, 0.0  ;;  %v952_v4 = vmul.f32 %v941_v63, %v941_v63 }
 0x93b   :  { %949 = vadd.xlane.f32.xlu1 %v948_v3  ;;  %v945_v6 = vsel %vm944_vm1, %v936_v2, 0.0  ;;  %v951_v7 = vmul.f32 %v936_v2, %v936_v2 }
 0x93c   :  { %946 = vadd.xlane.f32.xlu0 %v945_v6  ;;  %v956_v8 = vsel %vm944_vm1, %v952_v4, 0.0 }
 0x93d   :  { %v953_v9 = vsel %vm944_vm1, %v951_v7, 0.0 }
 0x93f   :  { %957 = vadd.xlane.f32.xlu1 %v956_v8 }
 0x940   :  { %954 = vadd.xlane.f32.xlu0 %v953_v9 }
 0x9c8   :  { %v950_v14 = vpop.xlane.xlu1 %949 }
 0x9c9   :  { %v960_v18 = vmul.f32 0.03125, %v950_v14  ;;  %v947_v20 = vpop.xlane.xlu0 %946 }
 0x9ca   :  { %v959_v21 = vmul.f32 0.03125, %v947_v20 }
 0x9cb   :  { %v964_v23 = vmul.f32 %v960_v18, %v960_v18  ;;  %v972_v34 = vsub.f32 %v941_v63, %v960_v18 }
 0x9cc   :  { %v958_v22 = vpop.xlane.xlu1 %957  ;;  %v963_v27 = vmul.f32 %v959_v21, %v959_v21  ;;  %v971_v38 = vsub.f32 %v936_v2, %v959_v21 }
 0x9cd   :  { %v962_v25 = vmul.f32 0.03125, %v958_v22  ;;  %v955_v26 = vpop.xlane.xlu0 %954 }
 0x9ce   :  { %v961_v28 = vmul.f32 0.03125, %v955_v26 }
 0x9cf   :  { %v966_v29 = vsub.f32 %v962_v25, %v964_v23 }
 0x9d0   :  { %v965_v30 = vsub.f32 %v961_v28, %v963_v27 }
 0x9d1   :  { %v968_v31 = vadd.f32 1e-05, %v966_v29 }
 0x9d2   :  { %v967_v32 = vadd.f32 1e-05, %v965_v30 }
 0x9d3   :  { %1686 = vrsqrt.f32 %v968_v31 }
 0x9d4   :  { %1688 = vrsqrt.f32 %v967_v32 }
 0x9dd   :  { %v1687_v35 = vpop.eup %1686 }
 0x9de   :  { %v1689_v40 = vpop.eup %1688  ;;  %v974_v42 = vmul.f32 %v1687_v35, %v972_v34 }
 0x9df   :  { %v973_v43 = vmul.f32 %v1689_v40, %v971_v38 }
 0x9e0   :  { %v980_v44 = vmul.f32 %v978_v33, %v974_v42 }
 0x9e1   :  { %v979_v47 = vmul.f32 %v978_v33, %v973_v43 }
 0x9e2   :  { %v986_v48 = vadd.f32 %v984_v41, %v980_v44 }
 0x9e3   :  { %v985_v50 = vadd.f32 %v984_v41, %v979_v47 }
 0x9e4   :  { %v990_v51 = vmul.f32 0.70710677, %v986_v48  ;;  %v988_v17 = vmul.f32 0.5, %v986_v48 }
 0x9e5   :  { %v989_v53 = vmul.f32 0.70710677, %v985_v50  ;;  %v987_v52 = vmul.f32 0.5, %v985_v50 }
 0x9e6   :  { %1690 = verf.f32 %v990_v51 }
 0x9e7   :  { %1692 = verf.f32 %v989_v53 }
 0x9f0   :  { %v1691_v0 = vpop.eup %1690 }
 0x9f1   :  { %v1693_v39 = vpop.eup %1692  ;;  %v994_v5 = vadd.f32 1.0, %v1691_v0 }
 0x9f2   :  { %v993_v55 = vadd.f32 1.0, %v1693_v39 }
 0x9f3   :  { %v996_v57 = vmul.f32 %v994_v5, %v988_v17 }
 0x9f4   :  { %v995_v56 = vmul.f32 %v993_v55, %v987_v52 }
 0x9f6   :  { %1441 = vmatprep.mubr.msk.f32.mxu0 %vm944_vm1, %v995_v56 }
 0x9f7   :  { %1442 = vmatmul.mubr.msk.f32.vlgmr.msra.gmra.mrb[8].mxu0 %vm944_vm1, %v996_v57 }
 0xaca   :  { %v1443_v54 = vpop.f32.mrb[8].mxu0 }
 0xacb   :  { %v1079_v46 = vadd.f32 %v1443_v54, %v1000_v49  ;;  %v1073_v58 = vpop.f32.mrb[9].mxu0 }
 0xacc   :  { %v1074_v59 = vadd.f32 %v1073_v58, %v1000_v49 }
 0xacd   :  { %1694 = vtanh.f32 %v1079_v46 }
 0xace   :  { %1696 = vtanh.f32 %v1074_v59 }
 0xad7   :  { %v1695_v60 = vpop.eup %1694 }
 0xad8   :  { %v1697_v16 = vpop.eup %1696  ;;  %v1085_v61 = vadd.f32 1.0, %v1695_v60 }
 0xad9   :  { %v1084_v24 = vadd.f32 1.0, %v1697_v16 }
 0xada   :  { %v1087_v62 = vmul.f32 0.5, %v1085_v61 }
 0xadb   :  { %v1086_v63 = vmul.f32 0.5, %v1084_v24 }
 0xadc   :  { %1090 = vst.msk [vmem:[%s2009_s4 + $0x8] sm:$0xff] %vm1088_vm2, %v1087_v62 }
 0xadd   :  { %1089 = vst.msk [vmem:[%s2009_s4] sm:$0xff] %vm1088_vm2, %v1086_v63 }
 0xade   :  { %1095 = vsyncpa [#allocation3], 1 }
 0xadf   :  { %1096 = vsyncpa [#allocation5], 1 }
 0xae0   :  { %1097 = vsyncpa [#allocation8], 1 }

</bundles_post_ra>
